<compile_context>
chip_gen: v7x
topology: tpu7x:2x2x1
jax: 0.10.0
libtpu: 0.0.40
codegen_flags: <defaults>
</compile_context>

<pallas_src>
import jax
import jax.numpy as jnp
from jax.experimental import pallas as pl
from jax.experimental.pallas import tpu as pltpu

IN_PAD = 128    # padded input feature width   (29 real -> 128)
HID_PAD = 256   # padded hidden / weight lane width
OUT_PAD = 128   # lane-dense output width (real n_actions = 2 lives in cols 0:2)
TM = 256        # batch rows per grid step (MXU-aligned on v5e/v6e/v7x)

# Row layout of the packed (1152, 256) weight slab: w1 | w2 | w3 | w4 | w5.
_W_ROWS = (IN_PAD, HID_PAD, HID_PAD, HID_PAD, HID_PAD)
_W_OFFSETS = (0, IN_PAD, IN_PAD + HID_PAD, IN_PAD + 2 * HID_PAD, IN_PAD + 3 * HID_PAD)
_SLAB_ROWS = IN_PAD + 4 * HID_PAD   # 1152


def mlp_kernel(x_ref, w_ref, b_ref, o_ref):
    """x_ref:(TM,128) bf16, w_ref:(1152,256) bf16, b_ref:(8,256) f32, o_ref:(TM,128) f32."""
    h = x_ref[...]                                               # (TM, 128) bf16
    # fc1..fc4: MXU matmul (f32 accumulate) + bias + relu. Padded lanes stay exactly 0
    # because both the padded weight columns and padded bias entries are 0.
    for layer in range(4):
        w = w_ref[pl.ds(_W_OFFSETS[layer], _W_ROWS[layer]), :]   # (rows, 256) bf16
        b = b_ref[pl.ds(layer, 1), :]                            # (1, 256)    f32
        y = jnp.dot(h, w, preferred_element_type=jnp.float32) + b
        h = jnp.maximum(y, 0.0).astype(jnp.bfloat16)             # relu, back to bf16
    # fc5 + tanh; keep the HBM store lane-dense at 128 columns.
    w5 = w_ref[pl.ds(_W_OFFSETS[4], _W_ROWS[4]), :]              # (256, 256) bf16
    y = jnp.dot(h, w5, preferred_element_type=jnp.float32) + b_ref[pl.ds(4, 1), :]
    o_ref[...] = jnp.tanh(y)[:, :OUT_PAD].astype(o_ref.dtype)


def _round_up(n, m):
    return (n + m - 1) // m * m


def pack_mlp_params(params):
    """params: list of (w:(in,out), b:(1,out) or (out,)) f32 -> (bf16 weight slab, f32 bias slab)."""
    assert len(params) == 5
    w_blocks, b_rows = [], []
    for (w, b), rows in zip(params, _W_ROWS):
        w = jnp.asarray(w, jnp.float32)
        b = jnp.asarray(b, jnp.float32).reshape(1, -1)
        w_blocks.append(jnp.pad(w, ((0, rows - w.shape[0]), (0, HID_PAD - w.shape[1]))))
        b_rows.append(jnp.pad(b, ((0, 0), (0, HID_PAD - b.shape[1]))))
    w_slab = jnp.concatenate(w_blocks, axis=0).astype(jnp.bfloat16)        # (1152, 256)
    b_slab = jnp.pad(jnp.concatenate(b_rows, axis=0), ((0, 3), (0, 0)))    # (8, 256) f32
    return w_slab, b_slab


def pytorch_mlp_forward(x, params, *, tm=TM):
    """x: (B, 29) f32.  params: [(w, b)] * 5 with w:(in,out), b:(1,out).  Returns (B, 2) f32."""
    B, n_in = x.shape
    n_actions = params[-1][0].shape[1]
    w_slab, b_slab = pack_mlp_params(params)

    b_pad = _round_up(max(B, 1), tm)
    x_p = jnp.zeros((b_pad, IN_PAD), jnp.bfloat16).at[:B, :n_in].set(x.astype(jnp.bfloat16))
    n_tiles = b_pad // tm

    cost = pl.CostEstimate(
        flops=2 * b_pad * (IN_PAD * HID_PAD + 4 * HID_PAD * HID_PAD),
        transcendentals=b_pad * HID_PAD,
        bytes_accessed=int(w_slab.size) * 2 + int(b_slab.size) * 4
                       + int(x_p.size) * 2 + b_pad * OUT_PAD * 4,
    )

    out = pl.pallas_call(
        mlp_kernel,
        out_shape=jax.ShapeDtypeStruct((b_pad, OUT_PAD), jnp.float32),
        grid=(n_tiles,),
        in_specs=[
            pl.BlockSpec((tm, IN_PAD), lambda i: (i, 0)),        # activations stream per tile
            pl.BlockSpec(w_slab.shape, lambda i: (0, 0)),        # weight slab: VMEM-resident
            pl.BlockSpec(b_slab.shape, lambda i: (0, 0)),        # bias slab:   VMEM-resident
        ],
        out_specs=pl.BlockSpec((tm, OUT_PAD), lambda i: (i, 0)),
        compiler_params=pltpu.CompilerParams(dimension_semantics=("parallel",)),
        cost_estimate=cost,
    )(x_p, w_slab, b_slab)
    return out[:B, :n_actions]


def init_params(key, n_inputs=29, n_actions=2, layers=(256, 256, 64, 32)):
    """Deterministic init mimicking PyTorch nn.Linear default (U[-1/sqrt(fan_in), +])."""
    dims = [n_inputs, layers[0], layers[1], layers[2], layers[3], n_actions]
    params = []
    for i in range(len(dims) - 1):
        fan_in, fan_out = dims[i], dims[i + 1]
        key, kw, kb = jax.random.split(key, 3)
        bound = 1.0 / (fan_in ** 0.5)
        w = jax.random.uniform(kw, (fan_in, fan_out), jnp.float32, -bound, bound)
        b = jax.random.uniform(kb, (1, fan_out), jnp.float32, -bound, bound)
        params.append((w, b))
    return params


def reference_forward(x, params):
    """Pure-JAX reference mimicking the kernel numerics (bf16 MXU inputs, f32 accumulate)."""
    h = x.astype(jnp.bfloat16)
    y = None
    n = len(params)
    for i, (w, b) in enumerate(params):
        y = jnp.dot(h, w.astype(jnp.bfloat16),
                    preferred_element_type=jnp.float32) + b.reshape(1, -1)
        if i < n - 1:
            h = jnp.maximum(y, 0.0).astype(jnp.bfloat16)
        else:
            y = jnp.tanh(y)
    return y


if __name__ == "__main__":
    key = jax.random.PRNGKey(0)
    kx, kp = jax.random.split(key)

    params = init_params(kp, n_inputs=29, n_actions=2, layers=(256, 256, 64, 32))

    # batch=8 (grid of 1 tile) and batch=300 (grid of 2 tiles, exercises row padding).
    for batch in (8, 300):
        kx, k = jax.random.split(kx)
        x = jax.random.normal(k, (batch, 29), dtype=jnp.float32)

        out = jax.block_until_ready(pytorch_mlp_forward(x, params))
        ref = reference_forward(x, params)

        assert out.shape == (batch, 2), out.shape
        max_err = float(jnp.max(jnp.abs(out - ref)))
        assert jnp.allclose(out, ref, atol=2e-3, rtol=2e-3), f"mismatch, max_err={max_err}"

    print("KERNEL_OK")
</pallas_src>

<mosaic_0001>
module attributes {stable_mosaic.version = 11 : i64} {
  func.func @mlp_kernel(%arg0: i32, %arg1: memref<256x128xbf16, #tpu.memory_space<vmem>>, %arg2: memref<1152x256xbf16, #tpu.memory_space<vmem>>, %arg3: memref<8x256xf32, #tpu.memory_space<vmem>>, %arg4: memref<256x128xf32, #tpu.memory_space<vmem>>) attributes {dimension_semantics = [#tpu.dimension_semantics<parallel>], iteration_bounds = array<i64: 1>, scalar_prefetch = 0 : i64, scratch_operands = 0 : i64, tpu.core_type = #tpu.core_type<tc>, window_params = [{transform_indices = @transform_0, window_bounds = array<i64: 256, 128>}, {pipeline_mode = #tpu.pipeline_mode<synchronous>, transform_indices = @transform_1, window_bounds = array<i64: 1152, 256>}, {pipeline_mode = #tpu.pipeline_mode<synchronous>, transform_indices = @transform_2, window_bounds = array<i64: 8, 256>}, {transform_indices = @transform_3, window_bounds = array<i64: 256, 128>}]} {
    %c0 = arith.constant 0 : index
    %c0_0 = arith.constant 0 : index
    %0 = vector.load %arg1[%c0, %c0_0] : memref<256x128xbf16, #tpu.memory_space<vmem>>, vector<256x128xbf16>
    %c0_1 = arith.constant 0 : index
    %c0_2 = arith.constant 0 : index
    %1 = vector.load %arg2[%c0_1, %c0_2] : memref<1152x256xbf16, #tpu.memory_space<vmem>>, vector<128x256xbf16>
    %c0_3 = arith.constant 0 : index
    %c0_4 = arith.constant 0 : index
    %2 = vector.load %arg3[%c0_3, %c0_4] : memref<8x256xf32, #tpu.memory_space<vmem>>, vector<1x256xf32>
    %cst = arith.constant dense<0.000000e+00> : vector<256x256xf32>
    %3 = tpu.matmul %0, %1, %cst {dimension_numbers = #tpu.dot_dimension_numbers<[1], [0], [0], [1], [0, 0, 1, 1], [], []>} : vector<256x128xbf16>, vector<128x256xbf16>, vector<256x256xf32> -> vector<256x256xf32>
    %4 = vector.broadcast %2 : vector<1x256xf32> to vector<256x256xf32>
    %5 = arith.addf %3, %4 : vector<256x256xf32>
    %cst_5 = arith.constant 0.000000e+00 : f32
    %6 = vector.broadcast %cst_5 : f32 to vector<256x256xf32>
    %7 = arith.maximumf %5, %6 : vector<256x256xf32>
    %8 = arith.truncf %7 : vector<256x256xf32> to vector<256x256xbf16>
    %c128 = arith.constant 128 : index
    %c0_6 = arith.constant 0 : index
    %9 = vector.load %arg2[%c128, %c0_6] : memref<1152x256xbf16, #tpu.memory_space<vmem>>, vector<256x256xbf16>
    %c1 = arith.constant 1 : index
    %c0_7 = arith.constant 0 : index
    %10 = vector.load %arg3[%c1, %c0_7] : memref<8x256xf32, #tpu.memory_space<vmem>>, vector<1x256xf32>
    %cst_8 = arith.constant dense<0.000000e+00> : vector<256x256xf32>
    %11 = tpu.matmul %8, %9, %cst_8 {dimension_numbers = #tpu.dot_dimension_numbers<[1], [0], [0], [1], [0, 0, 1, 1], [], []>} : vector<256x256xbf16>, vector<256x256xbf16>, vector<256x256xf32> -> vector<256x256xf32>
    %12 = vector.broadcast %10 : vector<1x256xf32> to vector<256x256xf32>
    %13 = arith.addf %11, %12 : vector<256x256xf32>
    %cst_9 = arith.constant 0.000000e+00 : f32
    %14 = vector.broadcast %cst_9 : f32 to vector<256x256xf32>
    %15 = arith.maximumf %13, %14 : vector<256x256xf32>
    %16 = arith.truncf %15 : vector<256x256xf32> to vector<256x256xbf16>
    %c384 = arith.constant 384 : index
    %c0_10 = arith.constant 0 : index
    %17 = vector.load %arg2[%c384, %c0_10] : memref<1152x256xbf16, #tpu.memory_space<vmem>>, vector<256x256xbf16>
    %c2 = arith.constant 2 : index
    %c0_11 = arith.constant 0 : index
    %18 = vector.load %arg3[%c2, %c0_11] : memref<8x256xf32, #tpu.memory_space<vmem>>, vector<1x256xf32>
    %cst_12 = arith.constant dense<0.000000e+00> : vector<256x256xf32>
    %19 = tpu.matmul %16, %17, %cst_12 {dimension_numbers = #tpu.dot_dimension_numbers<[1], [0], [0], [1], [0, 0, 1, 1], [], []>} : vector<256x256xbf16>, vector<256x256xbf16>, vector<256x256xf32> -> vector<256x256xf32>
    %20 = vector.broadcast %18 : vector<1x256xf32> to vector<256x256xf32>
    %21 = arith.addf %19, %20 : vector<256x256xf32>
    %cst_13 = arith.constant 0.000000e+00 : f32
    %22 = vector.broadcast %cst_13 : f32 to vector<256x256xf32>
    %23 = arith.maximumf %21, %22 : vector<256x256xf32>
    %24 = arith.truncf %23 : vector<256x256xf32> to vector<256x256xbf16>
    %c640 = arith.constant 640 : index
    %c0_14 = arith.constant 0 : index
    %25 = vector.load %arg2[%c640, %c0_14] : memref<1152x256xbf16, #tpu.memory_space<vmem>>, vector<256x256xbf16>
    %c3 = arith.constant 3 : index
    %c0_15 = arith.constant 0 : index
    %26 = vector.load %arg3[%c3, %c0_15] : memref<8x256xf32, #tpu.memory_space<vmem>>, vector<1x256xf32>
    %cst_16 = arith.constant dense<0.000000e+00> : vector<256x256xf32>
    %27 = tpu.matmul %24, %25, %cst_16 {dimension_numbers = #tpu.dot_dimension_numbers<[1], [0], [0], [1], [0, 0, 1, 1], [], []>} : vector<256x256xbf16>, vector<256x256xbf16>, vector<256x256xf32> -> vector<256x256xf32>
    %28 = vector.broadcast %26 : vector<1x256xf32> to vector<256x256xf32>
    %29 = arith.addf %27, %28 : vector<256x256xf32>
    %cst_17 = arith.constant 0.000000e+00 : f32
    %30 = vector.broadcast %cst_17 : f32 to vector<256x256xf32>
    %31 = arith.maximumf %29, %30 : vector<256x256xf32>
    %32 = arith.truncf %31 : vector<256x256xf32> to vector<256x256xbf16>
    %c896 = arith.constant 896 : index
    %c0_18 = arith.constant 0 : index
    %33 = vector.load %arg2[%c896, %c0_18] : memref<1152x256xbf16, #tpu.memory_space<vmem>>, vector<256x256xbf16>
    %cst_19 = arith.constant dense<0.000000e+00> : vector<256x256xf32>
    %34 = tpu.matmul %32, %33, %cst_19 {dimension_numbers = #tpu.dot_dimension_numbers<[1], [0], [0], [1], [0, 0, 1, 1], [], []>} : vector<256x256xbf16>, vector<256x256xbf16>, vector<256x256xf32> -> vector<256x256xf32>
    %c4 = arith.constant 4 : index
    %c0_20 = arith.constant 0 : index
    %35 = vector.load %arg3[%c4, %c0_20] : memref<8x256xf32, #tpu.memory_space<vmem>>, vector<1x256xf32>
    %36 = vector.broadcast %35 : vector<1x256xf32> to vector<256x256xf32>
    %37 = arith.addf %34, %36 : vector<256x256xf32>
    %38 = math.tanh %37 : vector<256x256xf32>
    %39 = vector.extract_strided_slice %38 {offsets = [0, 0], sizes = [256, 128], strides = [1, 1]} : vector<256x256xf32> to vector<256x128xf32>
    %c0_21 = arith.constant 0 : index
    %c0_22 = arith.constant 0 : index
    %40 = vector.load %arg4[%c0_21, %c0_22] : memref<256x128xf32, #tpu.memory_space<vmem>>, vector<256x128xf32>
    tpu.vector_store %arg4[%c0_21, %c0_22], %39 {strides = array<i32>} : memref<256x128xf32, #tpu.memory_space<vmem>>, vector<256x128xf32>,
    return
  }
  func.func @transform_0(%arg0: i32) -> (i32, i32) {
    %c0_i32 = arith.constant 0 : i32
    %c0_i32_0 = arith.constant 0 : i32
    return %arg0, %c0_i32 : i32, i32
  }
  func.func @transform_1(%arg0: i32) -> (i32, i32) {
    %c0_i32 = arith.constant 0 : i32
    %c0_i32_0 = arith.constant 0 : i32
    %c0_i32_1 = arith.constant 0 : i32
    return %c0_i32, %c0_i32_0 : i32, i32
  }
  func.func @transform_2(%arg0: i32) -> (i32, i32) {
    %c0_i32 = arith.constant 0 : i32
    %c0_i32_0 = arith.constant 0 : i32
    %c0_i32_1 = arith.constant 0 : i32
    return %c0_i32, %c0_i32_0 : i32, i32
  }
  func.func @transform_3(%arg0: i32) -> (i32, i32) {
    %c0_i32 = arith.constant 0 : i32
    %c0_i32_0 = arith.constant 0 : i32
    return %arg0, %c0_i32 : i32, i32
  }
}

</mosaic_0001>

<bundles_post_ra>
// kernel: tpu_custom_call.1
= control target key start
LH: loop header
LB: loop body
LE: loop exit
PB: predicated region body
PF: predicated region fallthrough
CT: control target
= control target key end

     0   :  { %8 = vsyncpa [#allocation3], 0  ;;  %s3534_s0 = inlined_call_operand.hbm [shape: bf16[256,128], index: 0, kind: input, shape index: {}]   ;;  %s3535_s1 = inlined_call_operand.hbm [shape: bf16[1152,256], index: 1, kind: input, shape index: {}]   ;;  %s3536_s2 = inlined_call_operand.hbm [shape: f32[8,256], index: 2, kind: input, shape index: {}]   ;;  %s3537_s3 = inlined_call_operand.hbm [shape: f32[256,128], index: 3, kind: output, shape index: {}]  }
   0x1   :  { %9 = vsyncpa [#allocation6], 0 }
   0x2   :  { %10 = vsyncpa [#allocation4], 0  ;;  %s3080_s12 = smov [#allocation5]   ;;  %s2986_s16 = scalar_lea.hbm %s3535_s1, 18432 }
   0x3   :  { %s28_s13 = sshll.u32 %s3080_s12, 4  ;;  %p2987_p0 = scmp.ne.s32.totalorder %s3535_s1, %s2986_s16  ;;  %s29_s13 = int_to_ptr.vmem [resolvable:$true] %s28_s13 }
   0x4   :  { %p2990_p1 = scmp.lt.u32.totalorder %s2986_s16, %s3535_s1 }
   0x6   :  { %p2992_p2 = pnand %p2990_p1, %p2987_p0 }
   0x8   :  { %2995 = shalt.err (!%p2992_p2)
}
   0x9   :  { %s2996_s21 = scalar_lea.vmem %s29_s13, 18432  ;;  %p3001_p4 = scmp.lt.s32.totalorder %s29_s13, %s29_s13 }
   0xa   :  { %p2997_p3 = scmp.ne.s32.totalorder %s29_s13, %s2996_s21  ;;  %p3002_p5 = scmp.lt.s32.totalorder %s2996_s21, %s2996_s21 }
   0xc   :  { %p3003_p6 = por %p3002_p5, %p3001_p4 }
   0xe   :  { %p3004_p7 = pnand %p3003_p6, %p2997_p3 }
  0x10   :  { %3007 = shalt.err (!%p3004_p7)
}
  0x11   :  { %s3081_s22 = smov 128   ;;  %s3082_s23 = smov 8  }
  0x12   :  { %34 = dma.hbm_to_vmem [thread:$0]  %s3535_s1, 18432, %s29_s13, [#allocation6], %s3081_s22, %s3081_s22, %s3082_s23  }
  0x13   :  { %s3083_s26 = smov [#allocation2]   ;;  %s3008_s30 = scalar_lea.hbm %s3534_s0, 2048 }
  0x14   :  { %s16_s27 = sshll.u32 %s3083_s26, 4  ;;  %p3009_p8 = scmp.ne.s32.totalorder %s3534_s0, %s3008_s30  ;;  %s17_s27 = int_to_ptr.vmem [resolvable:$true] %s16_s27 }
  0x15   :  { %p3012_p9 = scmp.lt.u32.totalorder %s3008_s30, %s3534_s0 }
  0x17   :  { %p3014_p10 = pnand %p3012_p9, %p3009_p8 }
  0x19   :  { %3017 = shalt.err (!%p3014_p10)
}
  0x1a   :  { %s3018_s8 = scalar_lea.vmem %s17_s27, 2048  ;;  %p3023_p12 = scmp.lt.s32.totalorder %s17_s27, %s17_s27 }
  0x1b   :  { %p3019_p11 = scmp.ne.s32.totalorder %s17_s27, %s3018_s8  ;;  %p3024_p13 = scmp.lt.s32.totalorder %s3018_s8, %s3018_s8 }
  0x1d   :  { %p3025_p0 = por %p3024_p13, %p3023_p12 }
  0x1f   :  { %p3026_p1 = pnand %p3025_p0, %p3019_p11 }
  0x21   :  { %3029 = shalt.err (!%p3026_p1)
}
  0x22   :  { %s3084_s1 = smov 64   ;;  %s3085_s9 = smov 4  }
  0x23   :  { %22 = dma.hbm_to_vmem [thread:$0]  %s3534_s0, 2048, %s17_s27, [#allocation3], %s3084_s1, %s3084_s1, %s3085_s9  }
  0x24   :  { %s3086_s12 = smov [#allocation7]   ;;  %s3030_s16 = scalar_lea.hbm %s3536_s2, 256 }
  0x25   :  { %s41_s13 = sshll.u32 %s3086_s12, 4  ;;  %p3031_p2 = scmp.ne.s32.totalorder %s3536_s2, %s3030_s16  ;;  %s42_s13 = int_to_ptr.vmem [resolvable:$true] %s41_s13 }
  0x26   :  { %p3034_p3 = scmp.lt.u32.totalorder %s3030_s16, %s3536_s2 }
  0x28   :  { %p3036_p4 = pnand %p3034_p3, %p3031_p2 }
  0x2a   :  { %3039 = shalt.err (!%p3036_p4)
}
  0x2b   :  { %s3040_s21 = scalar_lea.vmem %s42_s13, 256  ;;  %p3045_p6 = scmp.lt.s32.totalorder %s42_s13, %s42_s13 }
  0x2c   :  { %p3041_p5 = scmp.ne.s32.totalorder %s42_s13, %s3040_s21  ;;  %p3046_p7 = scmp.lt.s32.totalorder %s3040_s21, %s3040_s21 }
  0x2e   :  { %p3047_p8 = por %p3046_p7, %p3045_p6 }
  0x30   :  { %p3048_p9 = pnand %p3047_p8, %p3041_p5 }
  0x32   :  { %3051 = shalt.err (!%p3048_p9)
}
  0x33   :  { %44 = dma.hbm_to_vmem [thread:$0]  %s3536_s2, 256, %s42_s13, [#allocation6]  }
  0x34   :  { %3074 = dma.done.wait [#allocation3], 2048  }
  0x35   :  { %3075 = vsyncadd [#allocation3], 4294965248 }
  0x36   :  { %3076 = dma.done.wait [#allocation6], 18688  }
  0x37   :  { %3077 = vsyncadd [#allocation6], 4294948608  ;;  %v3087_v0 = vmov 0   ;;  %v2690_v1 = vld [vmem:[#allocation5 + $0x4] ss:$8 sps:$4 sm:$0xff]   ;;  %v2716_v28 = vld [vmem:[#allocation2 + $0x10] sm:$0xff]  }
  0x38   :  { %323 = vmatprep.mubr.bf16.mxu0 %v3087_v0  ;;  %403 = vmatprep.mubr.bf16.mxu1 %v3087_v0  ;;  %v2692_v2 = vld [vmem:[#allocation5] ss:$8 sps:$4 sm:$0xff]   ;;  %v2693_v3 = vld [vmem:[#allocation5 + $0x14] ss:$8 sps:$4 sm:$0xff]   ;;  %v2695_v4 = vld [vmem:[#allocation5 + $0x10] ss:$8 sps:$4 sm:$0xff]  }
  0x39   :  { %291 = vmatprep.subr.bf16.mxu0 %v2690_v1  ;;  %2665 = vmatprep.subr.bf16.mxu1 %v2690_v1  ;;  %v2696_v5 = vld [vmem:[#allocation5 + $0x24] ss:$8 sps:$4 sm:$0xff]   ;;  %v2698_v6 = vld [vmem:[#allocation5 + $0x20] ss:$8 sps:$4 sm:$0xff]   ;;  %v2699_v7 = vld [vmem:[#allocation5 + $0x34] ss:$8 sps:$4 sm:$0xff]  }
  0x3a   :  { %292 = vmatpush1.bf16.msra.mxu0 %v2692_v2  ;;  %2673 = vmatpush1.bf16.msra.mxu1 %v2692_v2  ;;  %v2701_v8 = vld [vmem:[#allocation5 + $0x30] ss:$8 sps:$4 sm:$0xff]   ;;  %v2702_v9 = vld [vmem:[#allocation5 + $0x44] ss:$8 sps:$4 sm:$0xff]   ;;  %v2704_v10 = vld [vmem:[#allocation5 + $0x40] ss:$8 sps:$4 sm:$0xff]   ;;  %v105_v2 = vlaneseq }
  0x3b   :  { %293 = vmatprep.subr.bf16.mxu0 %v2693_v3  ;;  %2666 = vmatprep.subr.bf16.mxu1 %v2693_v3  ;;  %v2705_v11 = vld [vmem:[#allocation5 + $0x54] ss:$8 sps:$4 sm:$0xff]   ;;  %v2707_v12 = vld [vmem:[#allocation5 + $0x50] ss:$8 sps:$4 sm:$0xff]   ;;  %v2708_v13 = vld [vmem:[#allocation5 + $0x64] ss:$8 sps:$4 sm:$0xff]  }
  0x3c   :  { %v2710_v14 = vld [vmem:[#allocation5 + $0x60] ss:$8 sps:$4 sm:$0xff]   ;;  %v2711_v15 = vld [vmem:[#allocation5 + $0x74] ss:$8 sps:$4 sm:$0xff]   ;;  %v2713_v16 = vld [vmem:[#allocation5 + $0x70] ss:$8 sps:$4 sm:$0xff]  }
  0x3d   :  { %v2732_v17 = vld [vmem:[#allocation5 + $0x84] ss:$8 sps:$4 sm:$0xff]   ;;  %v2730_v20 = vld [vmem:[#allocation5 + $0x80] ss:$8 sps:$4 sm:$0xff]   ;;  %v2735_v21 = vld [vmem:[#allocation5 + $0x94] ss:$8 sps:$4 sm:$0xff]  }
  0x3e   :  { %294 = vmatpush1.bf16.msra.mxu0 %v2695_v4  ;;  %2674 = vmatpush1.bf16.msra.mxu1 %v2695_v4  ;;  %v2714_v18 = vld [vmem:[#allocation2] sm:$0xff]   ;;  %v2733_v22 = vld [vmem:[#allocation5 + $0x90] ss:$8 sps:$4 sm:$0xff]   ;;  %v2715_v24 = vld [vmem:[#allocation2 + $0x8] sm:$0xff]   ;;  %v106_v3 = vshrl.u32 %v105_v2, 7  ;;  %s3088_s2 = smov [#allocation8]  }
  0x3f   :  { %295 = vmatprep.subr.bf16.mxu0 %v2696_v5  ;;  %2667 = vmatprep.subr.bf16.mxu1 %v2696_v5  ;;  %v2722_v19 = vld [vmem:[#allocation2 + $0x40] sm:$0xff]   ;;  %v2723_v25 = vld [vmem:[#allocation2 + $0x48] sm:$0xff]   ;;  %v2741_v27 = vld [vmem:[#allocation5 + $0xb4] ss:$8 sps:$4 sm:$0xff]   ;;  %s2492_s25 = sshll.u32 %s3088_s2, 4  ;;  %s2493_s25 = int_to_ptr.vmem [resolvable:$true] %s2492_s25 }
  0x40   :  { %v2738_v23 = vld [vmem:[#allocation5 + $0xa4] ss:$8 sps:$4 sm:$0xff]   ;;  %v2736_v26 = vld [vmem:[#allocation5 + $0xa0] ss:$8 sps:$4 sm:$0xff]   ;;  %v2739_v29 = vld [vmem:[#allocation5 + $0xb0] ss:$8 sps:$4 sm:$0xff]   ;;  %p3057_p11 = scmp.lt.s32.totalorder %s2493_s25, %s2493_s25 }
  0x41   :  { %v2724_v30 = vld [vmem:[#allocation2 + $0x50] sm:$0xff]   ;;  %v2744_v31 = vld [vmem:[#allocation5 + $0xc4] ss:$8 sps:$4 sm:$0xff]   ;;  %v2742_v32 = vld [vmem:[#allocation5 + $0xc0] ss:$8 sps:$4 sm:$0xff]   ;;  %v3164_v4 = vsub.s32 0, %v106_v3 }
  0x42   :  { %296 = vmatpush1.bf16.msra.mxu0 %v2698_v6  ;;  %2675 = vmatpush1.bf16.msra.mxu1 %v2698_v6  ;;  %v2747_v33 = vld [vmem:[#allocation5 + $0xd4] ss:$8 sps:$4 sm:$0xff]   ;;  %v2745_v34 = vld [vmem:[#allocation5 + $0xd0] ss:$8 sps:$4 sm:$0xff]   ;;  %v2750_v35 = vld [vmem:[#allocation5 + $0xe4] ss:$8 sps:$4 sm:$0xff]  }
  0x43   :  { %297 = vmatprep.subr.bf16.mxu0 %v2699_v7  ;;  %2668 = vmatprep.subr.bf16.mxu1 %v2699_v7  ;;  %v2717_v36 = vld [vmem:[#allocation2 + $0x18] sm:$0xff]   ;;  %v2748_v38 = vld [vmem:[#allocation5 + $0xe0] ss:$8 sps:$4 sm:$0xff]   ;;  %v2756_v41 = vld [vmem:[#allocation5 + $0x104] ss:$8 sps:$4 sm:$0xff]   ;;  %v3166_v5 = vsub.s32 1, %v106_v3 }
  0x44   :  { %v2725_v37 = vld [vmem:[#allocation2 + $0x58] sm:$0xff]   ;;  %v2718_v42 = vld [vmem:[#allocation2 + $0x20] sm:$0xff]   ;;  %v2719_v48 = vld [vmem:[#allocation2 + $0x28] sm:$0xff]   ;;  %s3052_s26 = scalar_lea.vmem %s2493_s25, 4096 }
  0x45   :  { %v2753_v39 = vld [vmem:[#allocation5 + $0xf4] ss:$8 sps:$4 sm:$0xff]   ;;  %v2751_v40 = vld [vmem:[#allocation5 + $0xf0] ss:$8 sps:$4 sm:$0xff]   ;;  %v2726_v43 = vld [vmem:[#allocation2 + $0x60] sm:$0xff]   ;;  %p3053_p10 = scmp.ne.s32.totalorder %s2493_s25, %s3052_s26  ;;  %p3058_p12 = scmp.lt.s32.totalorder %s3052_s26, %s3052_s26 }
  0x46   :  { %298 = vmatpush1.bf16.msra.mxu0 %v2701_v8  ;;  %2676 = vmatpush1.bf16.msra.mxu1 %v2701_v8  ;;  %v2754_v44 = vld [vmem:[#allocation5 + $0x100] ss:$8 sps:$4 sm:$0xff]   ;;  %v2759_v45 = vld [vmem:[#allocation5 + $0x114] ss:$8 sps:$4 sm:$0xff]   ;;  %v2757_v46 = vld [vmem:[#allocation5 + $0x110] ss:$8 sps:$4 sm:$0xff]  }
  0x47   :  { %299 = vmatprep.subr.bf16.mxu0 %v2702_v9  ;;  %2669 = vmatprep.subr.bf16.mxu1 %v2702_v9  ;;  %v2762_v47 = vld [vmem:[#allocation5 + $0x124] ss:$8 sps:$4 sm:$0xff]   ;;  %v2760_v50 = vld [vmem:[#allocation5 + $0x120] ss:$8 sps:$4 sm:$0xff]   ;;  %v2765_v51 = vld [vmem:[#allocation5 + $0x134] ss:$8 sps:$4 sm:$0xff]   ;;  %p3059_p13 = por %p3058_p12, %p3057_p11 }
  0x48   :  { %v2727_v49 = vld [vmem:[#allocation2 + $0x68] sm:$0xff]   ;;  %v2763_v52 = vld [vmem:[#allocation5 + $0x130] ss:$8 sps:$4 sm:$0xff]   ;;  %v2771_v57 = vld [vmem:[#allocation5 + $0x154] ss:$8 sps:$4 sm:$0xff]  }
  0x49   :  { %v2768_v53 = vld [vmem:[#allocation5 + $0x144] ss:$8 sps:$4 sm:$0xff]   ;;  %v2720_v54 = vld [vmem:[#allocation2 + $0x30] sm:$0xff]   ;;  %v2766_v56 = vld [vmem:[#allocation5 + $0x140] ss:$8 sps:$4 sm:$0xff]   ;;  %p3060_p0 = pnand %p3059_p13, %p3053_p10 }
  0x4a   :  { %300 = vmatpush1.bf16.msra.mxu0 %v2704_v10  ;;  %2677 = vmatpush1.bf16.msra.mxu1 %v2704_v10  ;;  %v2728_v55 = vld [vmem:[#allocation2 + $0x70] sm:$0xff]   ;;  %v2721_v59 = vld [vmem:[#allocation2 + $0x38] sm:$0xff]   ;;  %v2774_v61 = vld [vmem:[#allocation5 + $0x164] ss:$8 sps:$4 sm:$0xff]  }
  0x4b   :  { %301 = vmatprep.subr.bf16.mxu0 %v2705_v11  ;;  %2670 = vmatprep.subr.bf16.mxu1 %v2705_v11  ;;  %v2769_v58 = vld [vmem:[#allocation5 + $0x150] ss:$8 sps:$4 sm:$0xff]   ;;  %v2772_v62 = vld [vmem:[#allocation5 + $0x160] ss:$8 sps:$4 sm:$0xff]   ;;  %v2777_v63 = vld [vmem:[#allocation5 + $0x174] ss:$8 sps:$4 sm:$0xff]  }
  0x4c   :  { %v2729_v60 = vld [vmem:[#allocation2 + $0x78] sm:$0xff]  }
  0x4d   :  { %v2775_v1 = vld [vmem:[#allocation5 + $0x170] ss:$8 sps:$4 sm:$0xff]  }
  0x4e   :  { %302 = vmatpush1.bf16.msra.mxu0 %v2707_v12  ;;  %2678 = vmatpush1.bf16.msra.mxu1 %v2707_v12 }
  0x4f   :  { %303 = vmatprep.subr.bf16.mxu0 %v2708_v13  ;;  %2671 = vmatprep.subr.bf16.mxu1 %v2708_v13 }
  0x52   :  { %304 = vmatpush1.bf16.msra.mxu0 %v2710_v14  ;;  %2679 = vmatpush1.bf16.msra.mxu1 %v2710_v14 }
  0x53   :  { %305 = vmatprep.subr.bf16.mxu0 %v2711_v15  ;;  %2672 = vmatprep.subr.bf16.mxu1 %v2711_v15 }
  0x56   :  { %306 = vmatpush1.bf16.msra.mxu0 %v2713_v16  ;;  %2680 = vmatpush1.bf16.msra.mxu1 %v2713_v16 }
  0x57   :  { %785 = vmatprep.subr.bf16.mxu1 %v2732_v17 }
  0x59   :  { %324 = vmatmul.mubr.bf16.vlgmr.msra.gmra.mrb[0].mxu0 %v2714_v18  ;;  %404 = vmatmul.mubr.bf16.vlgmr.msra.gmra.mrb[0].mxu1 %v2722_v19 }
  0x5a   :  { %333 = vmatprep.mubr.bf16.mxu0 %v3087_v0  ;;  %413 = vmatprep.mubr.bf16.mxu1 %v3087_v0 }
  0x5b   :  { %786 = vmatpush1.bf16.msra.mxu1 %v2730_v20 }
  0x5c   :  { %787 = vmatprep.subr.bf16.mxu1 %v2735_v21 }
  0x5f   :  { %788 = vmatpush1.bf16.msra.mxu1 %v2733_v22 }
  0x60   :  { %789 = vmatprep.subr.bf16.mxu1 %v2738_v23  ;;  %v2778_v23 = vld [vmem:[#allocation5 + $0x180] ss:$8 sps:$4 sm:$0xff]  }
  0x61   :  { %334 = vmatmul.mubr.bf16.gmra.mrb[4].mxu0 %v2715_v24  ;;  %414 = vmatmul.mubr.bf16.gmra.mrb[4].mxu1 %v2723_v25 }
  0x62   :  { %343 = vmatprep.mubr.bf16.mxu0 %v3087_v0  ;;  %423 = vmatprep.mubr.bf16.mxu1 %v3087_v0 }
  0x63   :  { %790 = vmatpush1.bf16.msra.mxu1 %v2736_v26 }
  0x64   :  { %791 = vmatprep.subr.bf16.mxu1 %v2741_v27  ;;  %v2780_v27 = vld [vmem:[#allocation5 + $0x184] ss:$8 sps:$4 sm:$0xff]  }
  0x65   :  { %1279 = vmatprep.subr.bf16.mxu0 %v2780_v27 }
  0x66   :  { %1280 = vmatpush1.bf16.msra.mxu0 %v2778_v23 }
  0x67   :  { %792 = vmatpush1.bf16.msra.mxu1 %v2739_v29 }
  0x68   :  { %793 = vmatprep.subr.bf16.mxu1 %v2744_v31  ;;  %v2783_v31 = vld [vmem:[#allocation5 + $0x194] ss:$8 sps:$4 sm:$0xff]  }
  0x69   :  { %344 = vmatmul.mubr.bf16.gmra.mrb[8].mxu0 %v2716_v28  ;;  %424 = vmatmul.mubr.bf16.gmra.mrb[8].mxu1 %v2724_v30 }
  0x6a   :  { %353 = vmatprep.mubr.bf16.mxu0 %v3087_v0  ;;  %433 = vmatprep.mubr.bf16.mxu1 %v3087_v0 }
  0x6b   :  { %794 = vmatpush1.bf16.msra.mxu1 %v2742_v32  ;;  %1281 = vmatprep.subr.bf16.mxu0 %v2783_v31 }
  0x6c   :  { %795 = vmatprep.subr.bf16.mxu1 %v2747_v33 }
  0x6f   :  { %796 = vmatpush1.bf16.msra.mxu1 %v2745_v34 }
  0x70   :  { %797 = vmatprep.subr.bf16.mxu1 %v2750_v35 }
  0x71   :  { %354 = vmatmul.mubr.bf16.gmra.mrb[12].mxu0 %v2717_v36  ;;  %434 = vmatmul.mubr.bf16.gmra.mrb[12].mxu1 %v2725_v37  ;;  %v2781_v37 = vld [vmem:[#allocation5 + $0x190] ss:$8 sps:$4 sm:$0xff]  }
  0x72   :  { %363 = vmatprep.mubr.bf16.mxu0 %v3087_v0  ;;  %443 = vmatprep.mubr.bf16.mxu1 %v3087_v0 }
  0x73   :  { %798 = vmatpush1.bf16.msra.mxu1 %v2748_v38  ;;  %1282 = vmatpush1.bf16.msra.mxu0 %v2781_v37 }
  0x74   :  { %799 = vmatprep.subr.bf16.mxu1 %v2753_v39 }
  0x77   :  { %800 = vmatpush1.bf16.msra.mxu1 %v2751_v40 }
  0x78   :  { %801 = vmatprep.subr.bf16.mxu1 %v2756_v41 }
  0x79   :  { %364 = vmatmul.mubr.bf16.gmra.mrb[16].mxu0 %v2718_v42  ;;  %444 = vmatmul.mubr.bf16.gmra.mrb[16].mxu1 %v2726_v43  ;;  %v2786_v42 = vld [vmem:[#allocation5 + $0x1a4] ss:$8 sps:$4 sm:$0xff]  }
  0x7a   :  { %373 = vmatprep.mubr.bf16.mxu0 %v3087_v0  ;;  %453 = vmatprep.mubr.bf16.mxu1 %v3087_v0 }
  0x7b   :  { %802 = vmatpush1.bf16.msra.mxu1 %v2754_v44  ;;  %1283 = vmatprep.subr.bf16.mxu0 %v2786_v42 }
  0x7c   :  { %803 = vmatprep.subr.bf16.mxu1 %v2759_v45 }
  0x7f   :  { %804 = vmatpush1.bf16.msra.mxu1 %v2757_v46 }
  0x80   :  { %805 = vmatprep.subr.bf16.mxu1 %v2762_v47 }
  0x81   :  { %374 = vmatmul.mubr.bf16.gmra.mrb[20].mxu0 %v2719_v48  ;;  %454 = vmatmul.mubr.bf16.gmra.mrb[20].mxu1 %v2727_v49 }
  0x82   :  { %383 = vmatprep.mubr.bf16.mxu0 %v3087_v0  ;;  %463 = vmatprep.mubr.bf16.mxu1 %v3087_v0 }
  0x83   :  { %806 = vmatpush1.bf16.msra.mxu1 %v2760_v50 }
  0x84   :  { %807 = vmatprep.subr.bf16.mxu1 %v2765_v51 }
  0x87   :  { %808 = vmatpush1.bf16.msra.mxu1 %v2763_v52 }
  0x88   :  { %809 = vmatprep.subr.bf16.mxu1 %v2768_v53 }
  0x89   :  { %384 = vmatmul.mubr.bf16.gmra.mrb[24].mxu0 %v2720_v54  ;;  %464 = vmatmul.mubr.bf16.gmra.mrb[24].mxu1 %v2728_v55 }
  0x8a   :  { %393 = vmatprep.mubr.bf16.mxu0 %v3087_v0  ;;  %473 = vmatprep.mubr.bf16.mxu1 %v3087_v0  ;;  %v103_v0 = vld [vmem:[#allocation7] ss:$8 sm:$0x3] }
  0x8b   :  { %810 = vmatpush1.bf16.msra.mxu1 %v2766_v56  ;;  %v3169_v6 = vrot.slane %v103_v0, %v3164_v4  ;;  %v3172_v7 = vrot.slane %v103_v0, %v3166_v5  ;;  %v2784_v56 = vld [vmem:[#allocation5 + $0x1a0] ss:$8 sps:$4 sm:$0xff]  }
  0x8c   :  { %811 = vmatprep.subr.bf16.mxu1 %v2771_v57  ;;  %1284 = vmatpush1.bf16.msra.mxu0 %v2784_v56 }
  0x8f   :  { %812 = vmatpush1.bf16.msra.mxu1 %v2769_v58 }
  0x90   :  { %813 = vmatprep.subr.bf16.mxu1 %v2774_v61 }
  0x91   :  { %394 = vmatmul.mubr.bf16.gmra.mrb[28].mxu0 %v2721_v59  ;;  %474 = vmatmul.mubr.bf16.gmra.mrb[28].mxu1 %v2729_v60  ;;  %v2789_v60 = vld [vmem:[#allocation5 + $0x1b4] ss:$8 sps:$4 sm:$0xff]  }
  0x92   :  { %1285 = vmatprep.subr.bf16.mxu0 %v2789_v60 }
  0x93   :  { %814 = vmatpush1.bf16.msra.mxu1 %v2772_v62 }
  0x94   :  { %815 = vmatprep.subr.bf16.mxu1 %v2777_v63 }
  0x97   :  { %816 = vmatpush1.bf16.msra.mxu1 %v2775_v1 }
 0x12c   :  { %v325_v8 = vpop.f32.mrb[0].mxu0  ;;  %v405_v9 = vpop.f32.mrb[0].mxu1 }
 0x12d   :  { %v326_v10 = vadd.f32 %v325_v8, %v3169_v6  ;;  %v327_v11 = vpop.f32.mrb[1].mxu0  ;;  %v406_v12 = vadd.f32 %v405_v9, %v3169_v6  ;;  %v407_v13 = vpop.f32.mrb[1].mxu1  ;;  %v2787_v9 = vld [vmem:[#allocation5 + $0x1b0] ss:$8 sps:$4 sm:$0xff]  }
 0x12e   :  { %v328_v14 = vadd.f32 %v327_v11, %v3172_v7  ;;  %v329_v15 = vpop.f32.mrb[2].mxu0  ;;  %v408_v16 = vadd.f32 %v407_v13, %v3172_v7  ;;  %v409_v17 = vpop.f32.mrb[2].mxu1  ;;  %1286 = vmatpush1.bf16.msra.mxu0 %v2787_v9 }
 0x12f   :  { %v330_v18 = vadd.f32 %v329_v15, %v3169_v6  ;;  %v331_v19 = vpop.f32.mrb[3].mxu0  ;;  %v516_v20 = vmax.f32 %v406_v12, 0.0  ;;  %v410_v21 = vadd.f32 %v409_v17, %v3169_v6  ;;  %v411_v22 = vpop.f32.mrb[3].mxu1  ;;  %v484_v28 = vmax.f32 %v326_v10, 0.0 }
 0x130   :  { %v332_v24 = vadd.f32 %v331_v19, %v3172_v7  ;;  %v517_v25 = vmax.f32 %v408_v16, 0.0  ;;  %v412_v26 = vadd.f32 %v411_v22, %v3172_v7  ;;  %v485_v32 = vmax.f32 %v328_v14, 0.0  ;;  %v2792_v14 = vld [vmem:[#allocation5 + $0x1c4] ss:$8 sps:$4 sm:$0xff]  }
 0x131   :  { %v486_v29 = vmax.f32 %v330_v18, 0.0  ;;  %v518_v30 = vmax.f32 %v410_v21, 0.0  ;;  %1287 = vmatprep.subr.bf16.mxu0 %v2792_v14 }
 0x132   :  { %v487_v33 = vmax.f32 %v332_v24, 0.0  ;;  %v519_v34 = vmax.f32 %v412_v26, 0.0 }
 0x133   :  { %v548_v35 = vpack.c.bf16 %v486_v29, %v484_v28  ;;  %v3182_v36 = vpack.c.bf16 %v518_v30, %v516_v20  ;;  %v2790_v28 = vld [vmem:[#allocation5 + $0x1c0] ss:$8 sps:$4 sm:$0xff]  }
 0x134   :  { %v549_v38 = vpack.c.bf16 %v487_v33, %v485_v32  ;;  %v335_v39 = vpop.f32.mrb[4].mxu0  ;;  %v3184_v40 = vpack.c.bf16 %v519_v34, %v517_v25  ;;  %v415_v41 = vpop.f32.mrb[4].mxu1  ;;  %v2795_v32 = vld [vmem:[#allocation5 + $0x1d4] ss:$8 sps:$4 sm:$0xff]   ;;  %1288 = vmatpush1.bf16.msra.mxu0 %v2790_v28 }
 0x135   :  { %v336_v43 = vadd.f32 %v335_v39, %v3169_v6  ;;  %v337_v44 = vpop.f32.mrb[5].mxu0  ;;  %v416_v45 = vadd.f32 %v415_v41, %v3169_v6  ;;  %v417_v46 = vpop.f32.mrb[5].mxu1  ;;  %1289 = vmatprep.subr.bf16.mxu0 %v2795_v32 }
 0x136   :  { %v338_v47 = vadd.f32 %v337_v44, %v3172_v7  ;;  %v339_v48 = vpop.f32.mrb[6].mxu0  ;;  %817 = vmatprep.mubr.bf16.mxu1 %v549_v38  ;;  %v418_v49 = vadd.f32 %v417_v46, %v3172_v7  ;;  %v419_v50 = vpop.f32.mrb[6].mxu1 }
 0x137   :  { %v340_v51 = vadd.f32 %v339_v48, %v3169_v6  ;;  %v341_v52 = vpop.f32.mrb[7].mxu0  ;;  %818 = vmatmul.mubr.bf16.vlgmr.msra.gmra.mrb[32].mxu1 %v548_v35  ;;  %v520_v53 = vmax.f32 %v416_v45, 0.0  ;;  %v420_v54 = vadd.f32 %v419_v50, %v3169_v6  ;;  %v421_v55 = vpop.f32.mrb[7].mxu1  ;;  %v488_v61 = vmax.f32 %v336_v43, 0.0  ;;  %v2793_v43 = vld [vmem:[#allocation5 + $0x1d0] ss:$8 sps:$4 sm:$0xff]  }
 0x138   :  { %v342_v57 = vadd.f32 %v341_v52, %v3172_v7  ;;  %v521_v58 = vmax.f32 %v418_v49, 0.0  ;;  %v422_v59 = vadd.f32 %v421_v55, %v3172_v7  ;;  %v489_v1 = vmax.f32 %v338_v47, 0.0  ;;  %v2798_v48 = vld [vmem:[#allocation5 + $0x1e4] ss:$8 sps:$4 sm:$0xff]   ;;  %1290 = vmatpush1.bf16.msra.mxu0 %v2793_v43  ;;  %v2807_v43 = vld [vmem:[#allocation5 + $0x214] ss:$8 sps:$4 sm:$0xff]  }
 0x139   :  { %v490_v62 = vmax.f32 %v340_v51, 0.0  ;;  %v522_v63 = vmax.f32 %v420_v54, 0.0  ;;  %1291 = vmatprep.subr.bf16.mxu0 %v2798_v48 }
 0x13a   :  { %v491_v2 = vmax.f32 %v342_v57, 0.0  ;;  %v523_v3 = vmax.f32 %v422_v59, 0.0 }
 0x13b   :  { %v550_v0 = vpack.c.bf16 %v490_v62, %v488_v61  ;;  %v3194_v8 = vpack.c.bf16 %v522_v63, %v520_v53  ;;  %v2796_v62 = vld [vmem:[#allocation5 + $0x1e0] ss:$8 sps:$4 sm:$0xff]  }
 0x13c   :  { %v551_v10 = vpack.c.bf16 %v491_v2, %v489_v1  ;;  %v345_v11 = vpop.f32.mrb[8].mxu0  ;;  %v3196_v12 = vpack.c.bf16 %v523_v3, %v521_v58  ;;  %v425_v13 = vpop.f32.mrb[8].mxu1  ;;  %v2801_v3 = vld [vmem:[#allocation5 + $0x1f4] ss:$8 sps:$4 sm:$0xff]   ;;  %1292 = vmatpush1.bf16.msra.mxu0 %v2796_v62 }
 0x13d   :  { %v346_v15 = vadd.f32 %v345_v11, %v3169_v6  ;;  %v347_v16 = vpop.f32.mrb[9].mxu0  ;;  %v426_v17 = vadd.f32 %v425_v13, %v3169_v6  ;;  %v427_v18 = vpop.f32.mrb[9].mxu1  ;;  %1293 = vmatprep.subr.bf16.mxu0 %v2801_v3 }
 0x13e   :  { %v348_v19 = vadd.f32 %v347_v16, %v3172_v7  ;;  %v349_v20 = vpop.f32.mrb[10].mxu0  ;;  %827 = vmatprep.mubr.bf16.mxu1 %v551_v10  ;;  %v428_v21 = vadd.f32 %v427_v18, %v3172_v7  ;;  %v429_v22 = vpop.f32.mrb[10].mxu1 }
 0x13f   :  { %v350_v23 = vadd.f32 %v349_v20, %v3169_v6  ;;  %v351_v24 = vpop.f32.mrb[11].mxu0  ;;  %828 = vmatmul.mubr.bf16.gmra.mrb[36].mxu1 %v550_v0  ;;  %v524_v25 = vmax.f32 %v426_v17, 0.0  ;;  %v430_v26 = vadd.f32 %v429_v22, %v3169_v6  ;;  %v431_v27 = vpop.f32.mrb[11].mxu1  ;;  %v492_v33 = vmax.f32 %v346_v15, 0.0  ;;  %v2799_v17 = vld [vmem:[#allocation5 + $0x1f0] ss:$8 sps:$4 sm:$0xff]  }
 0x140   :  { %v352_v29 = vadd.f32 %v351_v24, %v3172_v7  ;;  %v525_v30 = vmax.f32 %v428_v21, 0.0  ;;  %v432_v31 = vadd.f32 %v431_v27, %v3172_v7  ;;  %v493_v37 = vmax.f32 %v348_v19, 0.0  ;;  %v2804_v22 = vld [vmem:[#allocation5 + $0x204] ss:$8 sps:$4 sm:$0xff]   ;;  %1294 = vmatpush1.bf16.msra.mxu0 %v2799_v17 }
 0x141   :  { %v494_v34 = vmax.f32 %v350_v23, 0.0  ;;  %v526_v35 = vmax.f32 %v430_v26, 0.0  ;;  %1295 = vmatprep.subr.bf16.mxu0 %v2804_v22 }
 0x142   :  { %v495_v38 = vmax.f32 %v352_v29, 0.0  ;;  %v527_v39 = vmax.f32 %v432_v31, 0.0 }
 0x143   :  { %v552_v41 = vpack.c.bf16 %v494_v34, %v492_v33  ;;  %v3206_v42 = vpack.c.bf16 %v526_v35, %v524_v25 }
 0x144   :  { %v553_v44 = vpack.c.bf16 %v495_v38, %v493_v37  ;;  %v355_v45 = vpop.f32.mrb[12].mxu0  ;;  %v3208_v46 = vpack.c.bf16 %v527_v39, %v525_v30  ;;  %v435_v47 = vpop.f32.mrb[12].mxu1  ;;  %v2802_v37 = vld [vmem:[#allocation5 + $0x200] ss:$8 sps:$4 sm:$0xff]  }
 0x145   :  { %v356_v49 = vadd.f32 %v355_v45, %v3169_v6  ;;  %v357_v50 = vpop.f32.mrb[13].mxu0  ;;  %v436_v51 = vadd.f32 %v435_v47, %v3169_v6  ;;  %v437_v52 = vpop.f32.mrb[13].mxu1  ;;  %1296 = vmatpush1.bf16.msra.mxu0 %v2802_v37 }
 0x146   :  { %v358_v53 = vadd.f32 %v357_v50, %v3172_v7  ;;  %v359_v54 = vpop.f32.mrb[14].mxu0  ;;  %837 = vmatprep.mubr.bf16.mxu1 %v553_v44  ;;  %v438_v55 = vadd.f32 %v437_v52, %v3172_v7  ;;  %v439_v56 = vpop.f32.mrb[14].mxu1  ;;  %1297 = vmatprep.subr.bf16.mxu0 %v2807_v43 }
 0x147   :  { %v360_v57 = vadd.f32 %v359_v54, %v3169_v6  ;;  %v361_v58 = vpop.f32.mrb[15].mxu0  ;;  %838 = vmatmul.mubr.bf16.gmra.mrb[40].mxu1 %v552_v41  ;;  %v528_v59 = vmax.f32 %v436_v51, 0.0  ;;  %v440_v60 = vadd.f32 %v439_v56, %v3169_v6  ;;  %v441_v61 = vpop.f32.mrb[15].mxu1  ;;  %v496_v0 = vmax.f32 %v356_v49, 0.0 }
 0x148   :  { %v362_v63 = vadd.f32 %v361_v58, %v3172_v7  ;;  %v529_v1 = vmax.f32 %v438_v55, 0.0  ;;  %v442_v2 = vadd.f32 %v441_v61, %v3172_v7  ;;  %v497_v11 = vmax.f32 %v358_v53, 0.0  ;;  %v2805_v53 = vld [vmem:[#allocation5 + $0x210] ss:$8 sps:$4 sm:$0xff]   ;;  %v2810_v58 = vld [vmem:[#allocation5 + $0x224] ss:$8 sps:$4 sm:$0xff]  }
 0x149   :  { %v498_v9 = vmax.f32 %v360_v57, 0.0  ;;  %v530_v10 = vmax.f32 %v440_v60, 0.0  ;;  %1298 = vmatpush1.bf16.msra.mxu0 %v2805_v53  ;;  %v2814_v53 = vld [vmem:[#allocation5 + $0x240] ss:$8 sps:$4 sm:$0xff]  }
 0x14a   :  { %v499_v13 = vmax.f32 %v362_v63, 0.0  ;;  %v531_v14 = vmax.f32 %v442_v2, 0.0  ;;  %1299 = vmatprep.subr.bf16.mxu0 %v2810_v58  ;;  %v2819_v58 = vld [vmem:[#allocation5 + $0x254] ss:$8 sps:$4 sm:$0xff]  }
 0x14b   :  { %v554_v15 = vpack.c.bf16 %v498_v9, %v496_v0  ;;  %v3218_v16 = vpack.c.bf16 %v530_v10, %v528_v59 }
 0x14c   :  { %v555_v18 = vpack.c.bf16 %v499_v13, %v497_v11  ;;  %v365_v19 = vpop.f32.mrb[16].mxu0  ;;  %v3220_v20 = vpack.c.bf16 %v531_v14, %v529_v1  ;;  %v445_v21 = vpop.f32.mrb[16].mxu1  ;;  %v2808_v14 = vld [vmem:[#allocation5 + $0x220] ss:$8 sps:$4 sm:$0xff]  }
 0x14d   :  { %v366_v23 = vadd.f32 %v365_v19, %v3169_v6  ;;  %v367_v24 = vpop.f32.mrb[17].mxu0  ;;  %v446_v25 = vadd.f32 %v445_v21, %v3169_v6  ;;  %v447_v26 = vpop.f32.mrb[17].mxu1  ;;  %v2813_v19 = vld [vmem:[#allocation5 + $0x234] ss:$8 sps:$4 sm:$0xff]   ;;  %1300 = vmatpush1.bf16.msra.mxu0 %v2808_v14 }
 0x14e   :  { %v368_v27 = vadd.f32 %v367_v24, %v3172_v7  ;;  %v369_v28 = vpop.f32.mrb[18].mxu0  ;;  %847 = vmatprep.mubr.bf16.mxu1 %v555_v18  ;;  %v448_v29 = vadd.f32 %v447_v26, %v3172_v7  ;;  %v449_v30 = vpop.f32.mrb[18].mxu1  ;;  %1301 = vmatprep.subr.bf16.mxu0 %v2813_v19 }
 0x14f   :  { %v370_v31 = vadd.f32 %v369_v28, %v3169_v6  ;;  %v371_v32 = vpop.f32.mrb[19].mxu0  ;;  %848 = vmatmul.mubr.bf16.gmra.mrb[44].mxu1 %v554_v15  ;;  %v532_v33 = vmax.f32 %v446_v25, 0.0  ;;  %v450_v34 = vadd.f32 %v449_v30, %v3169_v6  ;;  %v451_v35 = vpop.f32.mrb[19].mxu1  ;;  %v500_v44 = vmax.f32 %v366_v23, 0.0 }
 0x150   :  { %v372_v38 = vadd.f32 %v371_v32, %v3172_v7  ;;  %v533_v39 = vmax.f32 %v448_v29, 0.0  ;;  %v452_v41 = vadd.f32 %v451_v35, %v3172_v7  ;;  %v501_v48 = vmax.f32 %v368_v27, 0.0  ;;  %v2811_v29 = vld [vmem:[#allocation5 + $0x230] ss:$8 sps:$4 sm:$0xff]  }
 0x151   :  { %v502_v45 = vmax.f32 %v370_v31, 0.0  ;;  %v534_v47 = vmax.f32 %v450_v34, 0.0  ;;  %v2816_v34 = vld [vmem:[#allocation5 + $0x244] ss:$8 sps:$4 sm:$0xff]   ;;  %1302 = vmatpush1.bf16.msra.mxu0 %v2811_v29 }
 0x152   :  { %v503_v49 = vmax.f32 %v372_v38, 0.0  ;;  %v535_v50 = vmax.f32 %v452_v41, 0.0  ;;  %1303 = vmatprep.subr.bf16.mxu0 %v2816_v34 }
 0x153   :  { %v556_v51 = vpack.c.bf16 %v502_v45, %v500_v44  ;;  %v3230_v52 = vpack.c.bf16 %v534_v47, %v532_v33 }
 0x154   :  { %v557_v54 = vpack.c.bf16 %v503_v49, %v501_v48  ;;  %v375_v55 = vpop.f32.mrb[20].mxu0  ;;  %v3232_v56 = vpack.c.bf16 %v535_v50, %v533_v39  ;;  %v455_v57 = vpop.f32.mrb[20].mxu1 }
 0x155   :  { %v376_v59 = vadd.f32 %v375_v55, %v3169_v6  ;;  %v377_v60 = vpop.f32.mrb[21].mxu0  ;;  %v456_v61 = vadd.f32 %v455_v57, %v3169_v6  ;;  %v457_v62 = vpop.f32.mrb[21].mxu1  ;;  %1304 = vmatpush1.bf16.msra.mxu0 %v2814_v53 }
 0x156   :  { %v378_v63 = vadd.f32 %v377_v60, %v3172_v7  ;;  %v379_v1 = vpop.f32.mrb[22].mxu0  ;;  %857 = vmatprep.mubr.bf16.mxu1 %v557_v54  ;;  %v458_v2 = vadd.f32 %v457_v62, %v3172_v7  ;;  %v459_v3 = vpop.f32.mrb[22].mxu1  ;;  %1305 = vmatprep.subr.bf16.mxu0 %v2819_v58  ;;  %v2838_v58 = vld [vmem:[#allocation5 + $0x2c0] ss:$8 sps:$4 sm:$0xff]  }
 0x157   :  { %v380_v0 = vadd.f32 %v379_v1, %v3169_v6  ;;  %v381_v9 = vpop.f32.mrb[23].mxu0  ;;  %858 = vmatmul.mubr.bf16.gmra.mrb[48].mxu1 %v556_v51  ;;  %v536_v10 = vmax.f32 %v456_v61, 0.0  ;;  %v460_v11 = vadd.f32 %v459_v3, %v3169_v6  ;;  %v461_v13 = vpop.f32.mrb[23].mxu1  ;;  %v504_v21 = vmax.f32 %v376_v59, 0.0 }
 0x158   :  { %v382_v15 = vadd.f32 %v381_v9, %v3172_v7  ;;  %v537_v17 = vmax.f32 %v458_v2, 0.0  ;;  %v462_v18 = vadd.f32 %v461_v13, %v3172_v7  ;;  %v505_v24 = vmax.f32 %v378_v63, 0.0 }
 0x159   :  { %v506_v22 = vmax.f32 %v380_v0, 0.0  ;;  %v538_v23 = vmax.f32 %v460_v11, 0.0  ;;  %v2817_v0 = vld [vmem:[#allocation5 + $0x250] ss:$8 sps:$4 sm:$0xff]  }
 0x15a   :  { %v507_v25 = vmax.f32 %v382_v15, 0.0  ;;  %v539_v26 = vmax.f32 %v462_v18, 0.0  ;;  %1306 = vmatpush1.bf16.msra.mxu0 %v2817_v0  ;;  %v2841_v0 = vld [vmem:[#allocation5 + $0x2d0] ss:$8 sps:$4 sm:$0xff]  }
 0x15b   :  { %v558_v27 = vpack.c.bf16 %v506_v22, %v504_v21  ;;  %v3242_v28 = vpack.c.bf16 %v538_v23, %v536_v10 }
 0x15c   :  { %v559_v30 = vpack.c.bf16 %v507_v25, %v505_v24  ;;  %v385_v31 = vpop.f32.mrb[24].mxu0  ;;  %v3244_v32 = vpack.c.bf16 %v539_v26, %v537_v17  ;;  %v465_v33 = vpop.f32.mrb[24].mxu1 }
 0x15d   :  { %v386_v35 = vadd.f32 %v385_v31, %v3169_v6  ;;  %v387_v37 = vpop.f32.mrb[25].mxu0  ;;  %v466_v38 = vadd.f32 %v465_v33, %v3169_v6  ;;  %v467_v39 = vpop.f32.mrb[25].mxu1 }
 0x15e   :  { %v388_v41 = vadd.f32 %v387_v37, %v3172_v7  ;;  %v389_v43 = vpop.f32.mrb[26].mxu0  ;;  %867 = vmatprep.mubr.bf16.mxu1 %v559_v30  ;;  %v468_v44 = vadd.f32 %v467_v39, %v3172_v7  ;;  %v469_v45 = vpop.f32.mrb[26].mxu1 }
 0x15f   :  { %v390_v47 = vadd.f32 %v389_v43, %v3169_v6  ;;  %v391_v48 = vpop.f32.mrb[27].mxu0  ;;  %868 = vmatmul.mubr.bf16.gmra.mrb[52].mxu1 %v558_v27  ;;  %v540_v49 = vmax.f32 %v466_v38, 0.0  ;;  %v470_v50 = vadd.f32 %v469_v45, %v3169_v6  ;;  %v471_v51 = vpop.f32.mrb[27].mxu1  ;;  %v508_v59 = vmax.f32 %v386_v35, 0.0 }
 0x160   :  { %v392_v54 = vadd.f32 %v391_v48, %v3172_v7  ;;  %v541_v55 = vmax.f32 %v468_v44, 0.0  ;;  %v472_v57 = vadd.f32 %v471_v51, %v3172_v7  ;;  %v509_v62 = vmax.f32 %v388_v41, 0.0  ;;  %v2825_v48 = vld [vmem:[#allocation5 + $0x274] ss:$8 sps:$4 sm:$0xff]  }
 0x161   :  { %v510_v60 = vmax.f32 %v390_v47, 0.0  ;;  %v542_v61 = vmax.f32 %v470_v50, 0.0 }
 0x162   :  { %v511_v63 = vmax.f32 %v392_v54, 0.0  ;;  %v543_v1 = vmax.f32 %v472_v57, 0.0 }
 0x163   :  { %v560_v2 = vpack.c.bf16 %v510_v60, %v508_v59  ;;  %v576_v3 = vpack.c.bf16 %v542_v61, %v540_v49  ;;  %v2837_v49 = vld [vmem:[#allocation5 + $0x2b4] ss:$8 sps:$4 sm:$0xff]   ;;  %v2840_v59 = vld [vmem:[#allocation5 + $0x2c4] ss:$8 sps:$4 sm:$0xff]  }
 0x164   :  { %v561_v9 = vpack.c.bf16 %v511_v63, %v509_v62  ;;  %v395_v10 = vpop.f32.mrb[28].mxu0  ;;  %v577_v11 = vpack.c.bf16 %v543_v1, %v541_v55  ;;  %v475_v13 = vpop.f32.mrb[28].mxu1  ;;  %v2843_v61 = vld [vmem:[#allocation5 + $0x2d4] ss:$8 sps:$4 sm:$0xff]  }
 0x165   :  { %v396_v14 = vadd.f32 %v395_v10, %v3169_v6  ;;  %v397_v15 = vpop.f32.mrb[29].mxu0  ;;  %v476_v17 = vadd.f32 %v475_v13, %v3169_v6  ;;  %v477_v18 = vpop.f32.mrb[29].mxu1 }
 0x166   :  { %v398_v19 = vadd.f32 %v397_v15, %v3172_v7  ;;  %v399_v21 = vpop.f32.mrb[30].mxu0  ;;  %877 = vmatprep.mubr.bf16.mxu1 %v561_v9  ;;  %v478_v22 = vadd.f32 %v477_v18, %v3172_v7  ;;  %v479_v23 = vpop.f32.mrb[30].mxu1 }
 0x167   :  { %v400_v24 = vadd.f32 %v399_v21, %v3169_v6  ;;  %v401_v25 = vpop.f32.mrb[31].mxu0  ;;  %878 = vmatmul.mubr.bf16.gmra.mrb[56].mxu1 %v560_v2  ;;  %v544_v26 = vmax.f32 %v476_v17, 0.0  ;;  %v480_v27 = vadd.f32 %v479_v23, %v3169_v6  ;;  %v481_v29 = vpop.f32.mrb[31].mxu1  ;;  %v512_v34 = vmax.f32 %v396_v14, 0.0  ;;  %v2822_v6 = vld [vmem:[#allocation5 + $0x264] ss:$8 sps:$4 sm:$0xff]  }
 0x168   :  { %v402_v30 = vadd.f32 %v401_v25, %v3172_v7  ;;  %v545_v31 = vmax.f32 %v478_v22, 0.0  ;;  %v482_v33 = vadd.f32 %v481_v29, %v3172_v7  ;;  %v513_v38 = vmax.f32 %v398_v19, 0.0  ;;  %v2820_v7 = vld [vmem:[#allocation5 + $0x260] ss:$8 sps:$4 sm:$0xff]   ;;  %1307 = vmatprep.subr.bf16.mxu0 %v2822_v6  ;;  %v2849_v23 = vld [vmem:[#allocation5 + $0x2f4] ss:$8 sps:$4 sm:$0xff]  }
 0x169   :  { %v514_v35 = vmax.f32 %v400_v24, 0.0  ;;  %v546_v37 = vmax.f32 %v480_v27, 0.0  ;;  %1308 = vmatpush1.bf16.msra.mxu0 %v2820_v7  ;;  %v2844_v21 = vld [vmem:[#allocation5 + $0x2e0] ss:$8 sps:$4 sm:$0xff]  }
 0x16a   :  { %v515_v39 = vmax.f32 %v402_v30, 0.0  ;;  %v547_v41 = vmax.f32 %v482_v33, 0.0  ;;  %1309 = vmatprep.subr.bf16.mxu0 %v2825_v48  ;;  %v2847_v30 = vld [vmem:[#allocation5 + $0x2f0] ss:$8 sps:$4 sm:$0xff]  }
 0x16b   :  { %v562_v43 = vpack.c.bf16 %v514_v35, %v512_v34  ;;  %v578_v44 = vpack.c.bf16 %v546_v37, %v544_v26  ;;  %v2852_v34 = vld [vmem:[#allocation5 + $0x304] ss:$8 sps:$4 sm:$0xff]  }
 0x16c   :  { %v563_v45 = vpack.c.bf16 %v515_v39, %v513_v38  ;;  %v579_v47 = vpack.c.bf16 %v547_v41, %v545_v31 }
 0x16e   :  { %887 = vmatprep.mubr.bf16.mxu1 %v563_v45 }
 0x16f   :  { %888 = vmatmul.mubr.bf16.gmra.mrb[60].mxu1 %v562_v43 }
 0x170   :  { %897 = vmatprep.mubr.bf16.mxu1 %v3184_v40  ;;  %v2826_v40 = vld [vmem:[#allocation5 + $0x280] ss:$8 sps:$4 sm:$0xff]  }
 0x177   :  { %898 = vmatmul.mubr.bf16.gmra.mrb[64].mxu1 %v3182_v36  ;;  %v2823_v36 = vld [vmem:[#allocation5 + $0x270] ss:$8 sps:$4 sm:$0xff]  }
 0x178   :  { %907 = vmatprep.mubr.bf16.mxu1 %v3196_v12  ;;  %1310 = vmatpush1.bf16.msra.mxu0 %v2823_v36  ;;  %v2829_v12 = vld [vmem:[#allocation5 + $0x290] ss:$8 sps:$4 sm:$0xff]  }
 0x17f   :  { %908 = vmatmul.mubr.bf16.gmra.mrb[68].mxu1 %v3194_v8  ;;  %v2828_v8 = vld [vmem:[#allocation5 + $0x284] ss:$8 sps:$4 sm:$0xff]  }
 0x180   :  { %917 = vmatprep.mubr.bf16.mxu1 %v3208_v46  ;;  %1773 = vmatprep.subr.bf16.mxu1 %v2828_v8  ;;  %v613_v46 = vld [vmem:[#allocation7 + $0x1] ss:$8 sm:$0x3]  ;;  %v2853_v8 = vld [vmem:[#allocation5 + $0x310] ss:$8 sps:$4 sm:$0xff]  }
 0x181   :  { %1774 = vmatpush1.bf16.msra.mxu1 %v2826_v40 }
 0x187   :  { %918 = vmatmul.mubr.bf16.gmra.mrb[72].mxu1 %v3206_v42  ;;  %v2831_v42 = vld [vmem:[#allocation5 + $0x294] ss:$8 sps:$4 sm:$0xff]  }
 0x188   :  { %927 = vmatprep.mubr.bf16.mxu1 %v3220_v20  ;;  %1775 = vmatprep.subr.bf16.mxu1 %v2831_v42  ;;  %v2834_v20 = vld [vmem:[#allocation5 + $0x2a4] ss:$8 sps:$4 sm:$0xff]  }
 0x189   :  { %1776 = vmatpush1.bf16.msra.mxu1 %v2829_v12 }
 0x18a   :  { %1777 = vmatprep.subr.bf16.mxu1 %v2834_v20 }
 0x18f   :  { %928 = vmatmul.mubr.bf16.gmra.mrb[76].mxu1 %v3218_v16  ;;  %v2832_v16 = vld [vmem:[#allocation5 + $0x2a0] ss:$8 sps:$4 sm:$0xff]  }
 0x190   :  { %937 = vmatprep.mubr.bf16.mxu1 %v3232_v56  ;;  %v3278_v56 = vrot.slane %v613_v46, %v3166_v5  ;;  %1778 = vmatpush1.bf16.msra.mxu1 %v2832_v16 }
 0x191   :  { %1779 = vmatprep.subr.bf16.mxu1 %v2837_v49 }
 0x197   :  { %938 = vmatmul.mubr.bf16.gmra.mrb[80].mxu1 %v3230_v52  ;;  %v3275_v52 = vrot.slane %v613_v46, %v3164_v4  ;;  %v2858_v46 = vld [vmem:[#allocation5 + $0x324] ss:$8 sps:$4 sm:$0xff]  }
 0x198   :  { %947 = vmatprep.mubr.bf16.mxu1 %v3244_v32  ;;  %v2835_v32 = vld [vmem:[#allocation5 + $0x2b0] ss:$8 sps:$4 sm:$0xff]  }
 0x199   :  { %1780 = vmatpush1.bf16.msra.mxu1 %v2835_v32 }
 0x19a   :  { %1781 = vmatprep.subr.bf16.mxu1 %v2840_v59 }
 0x19d   :  { %1782 = vmatpush1.bf16.msra.mxu1 %v2838_v58 }
 0x19e   :  { %1783 = vmatprep.subr.bf16.mxu1 %v2843_v61  ;;  %v2859_v61 = vld [vmem:[#allocation5 + $0x330] ss:$8 sps:$4 sm:$0xff]  }
 0x19f   :  { %948 = vmatmul.mubr.bf16.gmra.mrb[84].mxu1 %v3242_v28 }
 0x1a0   :  { %957 = vmatprep.mubr.bf16.mxu1 %v577_v11  ;;  %v2846_v11 = vld [vmem:[#allocation5 + $0x2e4] ss:$8 sps:$4 sm:$0xff]  }
 0x1a1   :  { %1784 = vmatpush1.bf16.msra.mxu1 %v2841_v0 }
 0x1a2   :  { %1785 = vmatprep.subr.bf16.mxu1 %v2846_v11 }
 0x1a5   :  { %1786 = vmatpush1.bf16.msra.mxu1 %v2844_v21 }
 0x1a6   :  { %1787 = vmatprep.subr.bf16.mxu1 %v2849_v23  ;;  %v2865_v23 = vld [vmem:[#allocation5 + $0x350] ss:$8 sps:$4 sm:$0xff]  }
 0x1a7   :  { %958 = vmatmul.mubr.bf16.gmra.mrb[88].mxu1 %v576_v3 }
 0x1a8   :  { %967 = vmatprep.mubr.bf16.mxu1 %v579_v47  ;;  %v2855_v47 = vld [vmem:[#allocation5 + $0x314] ss:$8 sps:$4 sm:$0xff]  }
 0x1a9   :  { %1788 = vmatpush1.bf16.msra.mxu1 %v2847_v30 }
 0x1aa   :  { %1789 = vmatprep.subr.bf16.mxu1 %v2852_v34 }
 0x1af   :  { %968 = vmatmul.mubr.bf16.gmra.mrb[92].mxu1 %v578_v44  ;;  %v2850_v44 = vld [vmem:[#allocation5 + $0x300] ss:$8 sps:$4 sm:$0xff]  }
 0x1b0   :  { %1790 = vmatpush1.bf16.msra.mxu1 %v2850_v44 }
 0x1b1   :  { %1791 = vmatprep.subr.bf16.mxu1 %v2855_v47 }
 0x1b4   :  { %1792 = vmatpush1.bf16.msra.mxu1 %v2853_v8 }
 0x1b5   :  { %1793 = vmatprep.subr.bf16.mxu1 %v2858_v46 }
 0x20a   :  { %v819_v28 = vpop.f32.mrb[32].mxu1 }
 0x20b   :  { %v820_v50 = vadd.f32 %v819_v28, %v3275_v52  ;;  %v821_v51 = vpop.f32.mrb[33].mxu1 }
 0x20c   :  { %v822_v53 = vadd.f32 %v821_v51, %v3278_v56  ;;  %v823_v54 = vpop.f32.mrb[34].mxu1  ;;  %v2856_v51 = vld [vmem:[#allocation5 + $0x320] ss:$8 sps:$4 sm:$0xff]  }
 0x20d   :  { %v824_v55 = vadd.f32 %v823_v54, %v3275_v52  ;;  %v825_v57 = vpop.f32.mrb[35].mxu1  ;;  %v978_v62 = vmax.f32 %v820_v50, 0.0  ;;  %v2861_v54 = vld [vmem:[#allocation5 + $0x334] ss:$8 sps:$4 sm:$0xff]   ;;  %1794 = vmatpush1.bf16.msra.mxu1 %v2856_v51 }
 0x20e   :  { %v826_v60 = vadd.f32 %v825_v57, %v3278_v56  ;;  %v979_v1 = vmax.f32 %v822_v53, 0.0  ;;  %1795 = vmatprep.subr.bf16.mxu1 %v2861_v54 }
 0x20f   :  { %v980_v63 = vmax.f32 %v824_v55, 0.0 }
 0x210   :  { %v981_v2 = vmax.f32 %v826_v60, 0.0 }
 0x211   :  { %v1042_v3 = vpack.c.bf16 %v980_v63, %v978_v62  ;;  %1796 = vmatpush1.bf16.msra.mxu1 %v2859_v61 }
 0x212   :  { %v1043_v9 = vpack.c.bf16 %v981_v2, %v979_v1  ;;  %v829_v10 = vpop.f32.mrb[36].mxu1  ;;  %v2864_v1 = vld [vmem:[#allocation5 + $0x344] ss:$8 sps:$4 sm:$0xff]  }
 0x213   :  { %v830_v13 = vadd.f32 %v829_v10, %v3275_v52  ;;  %v831_v14 = vpop.f32.mrb[37].mxu1  ;;  %1797 = vmatprep.subr.bf16.mxu1 %v2864_v1 }
 0x214   :  { %v832_v15 = vadd.f32 %v831_v14, %v3278_v56  ;;  %v833_v17 = vpop.f32.mrb[38].mxu1  ;;  %1311 = vmatprep.mubr.bf16.mxu0 %v1043_v9 }
 0x215   :  { %v834_v18 = vadd.f32 %v833_v17, %v3275_v52  ;;  %v835_v19 = vpop.f32.mrb[39].mxu1  ;;  %1312 = vmatmul.mubr.bf16.vlgmr.msra.gmra.mrb[32].mxu0 %v1042_v3  ;;  %v982_v24 = vmax.f32 %v830_v13, 0.0  ;;  %v2862_v13 = vld [vmem:[#allocation5 + $0x340] ss:$8 sps:$4 sm:$0xff]  }
 0x216   :  { %v836_v22 = vadd.f32 %v835_v19, %v3278_v56  ;;  %v983_v26 = vmax.f32 %v832_v15, 0.0  ;;  %v2867_v15 = vld [vmem:[#allocation5 + $0x354] ss:$8 sps:$4 sm:$0xff]   ;;  %1798 = vmatpush1.bf16.msra.mxu1 %v2862_v13 }
 0x217   :  { %v984_v25 = vmax.f32 %v834_v18, 0.0  ;;  %1799 = vmatprep.subr.bf16.mxu1 %v2867_v15 }
 0x218   :  { %v985_v27 = vmax.f32 %v836_v22, 0.0 }
 0x219   :  { %v1044_v29 = vpack.c.bf16 %v984_v25, %v982_v24 }
 0x21a   :  { %v1045_v31 = vpack.c.bf16 %v985_v27, %v983_v26  ;;  %v839_v33 = vpop.f32.mrb[40].mxu1  ;;  %v2870_v26 = vld [vmem:[#allocation5 + $0x364] ss:$8 sps:$4 sm:$0xff]   ;;  %1800 = vmatpush1.bf16.msra.mxu1 %v2865_v23 }
 0x21b   :  { %v840_v35 = vadd.f32 %v839_v33, %v3275_v52  ;;  %v841_v37 = vpop.f32.mrb[41].mxu1  ;;  %1801 = vmatprep.subr.bf16.mxu1 %v2870_v26 }
 0x21c   :  { %v842_v38 = vadd.f32 %v841_v37, %v3278_v56  ;;  %v843_v39 = vpop.f32.mrb[42].mxu1  ;;  %1321 = vmatprep.mubr.bf16.mxu0 %v1045_v31 }
 0x21d   :  { %v844_v41 = vadd.f32 %v843_v39, %v3275_v52  ;;  %v845_v43 = vpop.f32.mrb[43].mxu1  ;;  %1322 = vmatmul.mubr.bf16.gmra.mrb[36].mxu0 %v1044_v29  ;;  %v986_v6 = vmax.f32 %v840_v35, 0.0  ;;  %v2868_v35 = vld [vmem:[#allocation5 + $0x360] ss:$8 sps:$4 sm:$0xff]  }
 0x21e   :  { %v846_v45 = vadd.f32 %v845_v43, %v3278_v56  ;;  %v987_v48 = vmax.f32 %v842_v38, 0.0  ;;  %1802 = vmatpush1.bf16.msra.mxu1 %v2868_v35 }
 0x21f   :  { %v988_v7 = vmax.f32 %v844_v41, 0.0 }
 0x220   :  { %v989_v36 = vmax.f32 %v846_v45, 0.0 }
 0x221   :  { %v1046_v40 = vpack.c.bf16 %v988_v7, %v986_v6 }
 0x222   :  { %v1047_v12 = vpack.c.bf16 %v989_v36, %v987_v48  ;;  %v849_v42 = vpop.f32.mrb[44].mxu1 }
 0x223   :  { %v850_v16 = vadd.f32 %v849_v42, %v3275_v52  ;;  %v851_v20 = vpop.f32.mrb[45].mxu1 }
 0x224   :  { %v852_v28 = vadd.f32 %v851_v20, %v3278_v56  ;;  %v853_v32 = vpop.f32.mrb[46].mxu1  ;;  %1331 = vmatprep.mubr.bf16.mxu0 %v1047_v12 }
 0x225   :  { %v854_v49 = vadd.f32 %v853_v32, %v3275_v52  ;;  %v855_v50 = vpop.f32.mrb[47].mxu1  ;;  %1332 = vmatmul.mubr.bf16.gmra.mrb[40].mxu0 %v1046_v40  ;;  %v990_v55 = vmax.f32 %v850_v16, 0.0 }
 0x226   :  { %v856_v53 = vadd.f32 %v855_v50, %v3278_v56  ;;  %v991_v58 = vmax.f32 %v852_v28, 0.0 }
 0x227   :  { %v992_v57 = vmax.f32 %v854_v49, 0.0 }
 0x228   :  { %v993_v59 = vmax.f32 %v856_v53, 0.0 }
 0x229   :  { %v1048_v60 = vpack.c.bf16 %v992_v57, %v990_v55 }
 0x22a   :  { %v1049_v62 = vpack.c.bf16 %v993_v59, %v991_v58  ;;  %v859_v63 = vpop.f32.mrb[48].mxu1 }
 0x22b   :  { %v860_v2 = vadd.f32 %v859_v63, %v3275_v52  ;;  %v861_v3 = vpop.f32.mrb[49].mxu1 }
 0x22c   :  { %v862_v0 = vadd.f32 %v861_v3, %v3278_v56  ;;  %v863_v9 = vpop.f32.mrb[50].mxu1  ;;  %1341 = vmatprep.mubr.bf16.mxu0 %v1049_v62 }
 0x22d   :  { %v864_v10 = vadd.f32 %v863_v9, %v3275_v52  ;;  %v865_v11 = vpop.f32.mrb[51].mxu1  ;;  %1342 = vmatmul.mubr.bf16.gmra.mrb[44].mxu0 %v1048_v60  ;;  %v994_v17 = vmax.f32 %v860_v2, 0.0 }
 0x22e   :  { %v866_v14 = vadd.f32 %v865_v11, %v3278_v56  ;;  %v995_v19 = vmax.f32 %v862_v0, 0.0 }
 0x22f   :  { %v996_v18 = vmax.f32 %v864_v10, 0.0 }
 0x230   :  { %v997_v21 = vmax.f32 %v866_v14, 0.0 }
 0x231   :  { %v1050_v22 = vpack.c.bf16 %v996_v18, %v994_v17 }
 0x232   :  { %v1051_v24 = vpack.c.bf16 %v997_v21, %v995_v19  ;;  %v869_v25 = vpop.f32.mrb[52].mxu1 }
 0x233   :  { %v870_v27 = vadd.f32 %v869_v25, %v3275_v52  ;;  %v871_v29 = vpop.f32.mrb[53].mxu1 }
 0x234   :  { %v872_v30 = vadd.f32 %v871_v29, %v3278_v56  ;;  %v873_v31 = vpop.f32.mrb[54].mxu1  ;;  %1351 = vmatprep.mubr.bf16.mxu0 %v1051_v24 }
 0x235   :  { %v874_v33 = vadd.f32 %v873_v31, %v3275_v52  ;;  %v875_v34 = vpop.f32.mrb[55].mxu1  ;;  %1352 = vmatmul.mubr.bf16.gmra.mrb[48].mxu0 %v1050_v22  ;;  %v998_v38 = vmax.f32 %v870_v27, 0.0 }
 0x236   :  { %v876_v37 = vadd.f32 %v875_v34, %v3278_v56  ;;  %v999_v41 = vmax.f32 %v872_v30, 0.0 }
 0x237   :  { %v1000_v39 = vmax.f32 %v874_v33, 0.0 }
 0x238   :  { %v1001_v43 = vmax.f32 %v876_v37, 0.0 }
 0x239   :  { %v1052_v44 = vpack.c.bf16 %v1000_v39, %v998_v38 }
 0x23a   :  { %v1053_v45 = vpack.c.bf16 %v1001_v43, %v999_v41  ;;  %v879_v47 = vpop.f32.mrb[56].mxu1 }
 0x23b   :  { %v880_v6 = vadd.f32 %v879_v47, %v3275_v52  ;;  %v881_v7 = vpop.f32.mrb[57].mxu1 }
 0x23c   :  { %v882_v48 = vadd.f32 %v881_v7, %v3278_v56  ;;  %v883_v36 = vpop.f32.mrb[58].mxu1  ;;  %1361 = vmatprep.mubr.bf16.mxu0 %v1053_v45 }
 0x23d   :  { %v884_v40 = vadd.f32 %v883_v36, %v3275_v52  ;;  %v885_v8 = vpop.f32.mrb[59].mxu1  ;;  %1362 = vmatmul.mubr.bf16.gmra.mrb[52].mxu0 %v1052_v44  ;;  %v1002_v42 = vmax.f32 %v880_v6, 0.0 }
 0x23e   :  { %v886_v12 = vadd.f32 %v885_v8, %v3278_v56  ;;  %v1003_v16 = vmax.f32 %v882_v48, 0.0 }
 0x23f   :  { %v1004_v46 = vmax.f32 %v884_v40, 0.0 }
 0x240   :  { %v1005_v20 = vmax.f32 %v886_v12, 0.0 }
 0x241   :  { %v1054_v28 = vpack.c.bf16 %v1004_v46, %v1002_v42 }
 0x242   :  { %v1055_v32 = vpack.c.bf16 %v1005_v20, %v1003_v16  ;;  %v889_v49 = vpop.f32.mrb[60].mxu1 }
 0x243   :  { %v890_v50 = vadd.f32 %v889_v49, %v3275_v52  ;;  %v891_v51 = vpop.f32.mrb[61].mxu1 }
 0x244   :  { %v892_v53 = vadd.f32 %v891_v51, %v3278_v56  ;;  %v893_v54 = vpop.f32.mrb[62].mxu1  ;;  %1371 = vmatprep.mubr.bf16.mxu0 %v1055_v32 }
 0x245   :  { %v894_v55 = vadd.f32 %v893_v54, %v3275_v52  ;;  %v895_v57 = vpop.f32.mrb[63].mxu1  ;;  %1372 = vmatmul.mubr.bf16.gmra.mrb[56].mxu0 %v1054_v28  ;;  %v1006_v59 = vmax.f32 %v890_v50, 0.0 }
 0x246   :  { %v896_v58 = vadd.f32 %v895_v57, %v3278_v56  ;;  %v1007_v61 = vmax.f32 %v892_v53, 0.0 }
 0x247   :  { %v1008_v60 = vmax.f32 %v894_v55, 0.0 }
 0x248   :  { %v1009_v62 = vmax.f32 %v896_v58, 0.0 }
 0x249   :  { %v1056_v63 = vpack.c.bf16 %v1008_v60, %v1006_v59 }
 0x24a   :  { %v1057_v1 = vpack.c.bf16 %v1009_v62, %v1007_v61  ;;  %v899_v2 = vpop.f32.mrb[64].mxu1 }
 0x24b   :  { %v900_v3 = vadd.f32 %v899_v2, %v3275_v52  ;;  %v901_v0 = vpop.f32.mrb[65].mxu1 }
 0x24c   :  { %v902_v9 = vadd.f32 %v901_v0, %v3278_v56  ;;  %v903_v10 = vpop.f32.mrb[66].mxu1  ;;  %1381 = vmatprep.mubr.bf16.mxu0 %v1057_v1 }
 0x24d   :  { %v904_v11 = vadd.f32 %v903_v10, %v3275_v52  ;;  %v905_v13 = vpop.f32.mrb[67].mxu1  ;;  %1382 = vmatmul.mubr.bf16.gmra.mrb[60].mxu0 %v1056_v63  ;;  %v1010_v15 = vmax.f32 %v900_v3, 0.0 }
 0x24e   :  { %v906_v14 = vadd.f32 %v905_v13, %v3278_v56  ;;  %v1011_v18 = vmax.f32 %v902_v9, 0.0  ;;  %v2873_v9 = vld [vmem:[#allocation5 + $0x374] ss:$8 sps:$4 sm:$0xff]  }
 0x24f   :  { %v1012_v17 = vmax.f32 %v904_v11, 0.0  ;;  %v2871_v11 = vld [vmem:[#allocation5 + $0x370] ss:$8 sps:$4 sm:$0xff]   ;;  %1803 = vmatprep.subr.bf16.mxu1 %v2873_v9  ;;  %v2885_v9 = vld [vmem:[#allocation5 + $0x3b4] ss:$8 sps:$4 sm:$0xff]  }
 0x250   :  { %v1013_v19 = vmax.f32 %v906_v14, 0.0  ;;  %1804 = vmatpush1.bf16.msra.mxu1 %v2871_v11 }
 0x251   :  { %v1058_v21 = vpack.c.bf16 %v1012_v17, %v1010_v15 }
 0x252   :  { %v1059_v22 = vpack.c.bf16 %v1013_v19, %v1011_v18  ;;  %v909_v23 = vpop.f32.mrb[68].mxu1 }
 0x253   :  { %v910_v24 = vadd.f32 %v909_v23, %v3275_v52  ;;  %v911_v25 = vpop.f32.mrb[69].mxu1 }
 0x254   :  { %v912_v26 = vadd.f32 %v911_v25, %v3278_v56  ;;  %v913_v27 = vpop.f32.mrb[70].mxu1  ;;  %1391 = vmatprep.mubr.bf16.mxu0 %v1059_v22 }
 0x255   :  { %v914_v29 = vadd.f32 %v913_v27, %v3275_v52  ;;  %v915_v30 = vpop.f32.mrb[71].mxu1  ;;  %1392 = vmatmul.mubr.bf16.gmra.mrb[64].mxu0 %v1058_v21  ;;  %v1014_v33 = vmax.f32 %v910_v24, 0.0 }
 0x256   :  { %v916_v31 = vadd.f32 %v915_v30, %v3278_v56  ;;  %v1015_v35 = vmax.f32 %v912_v26, 0.0 }
 0x257   :  { %v1016_v34 = vmax.f32 %v914_v29, 0.0 }
 0x258   :  { %v1017_v37 = vmax.f32 %v916_v31, 0.0 }
 0x259   :  { %v1060_v38 = vpack.c.bf16 %v1016_v34, %v1014_v33 }
 0x25a   :  { %v1061_v39 = vpack.c.bf16 %v1017_v37, %v1015_v35  ;;  %v919_v41 = vpop.f32.mrb[72].mxu1 }
 0x25b   :  { %v920_v43 = vadd.f32 %v919_v41, %v3275_v52  ;;  %v921_v44 = vpop.f32.mrb[73].mxu1 }
 0x25c   :  { %v922_v45 = vadd.f32 %v921_v44, %v3278_v56  ;;  %v923_v47 = vpop.f32.mrb[74].mxu1  ;;  %1401 = vmatprep.mubr.bf16.mxu0 %v1061_v39 }
 0x25d   :  { %v924_v6 = vadd.f32 %v923_v47, %v3275_v52  ;;  %v925_v7 = vpop.f32.mrb[75].mxu1  ;;  %1402 = vmatmul.mubr.bf16.gmra.mrb[68].mxu0 %v1060_v38  ;;  %v1018_v36 = vmax.f32 %v920_v43, 0.0 }
 0x25e   :  { %v926_v48 = vadd.f32 %v925_v7, %v3278_v56  ;;  %v1019_v8 = vmax.f32 %v922_v45, 0.0 }
 0x25f   :  { %v1020_v40 = vmax.f32 %v924_v6, 0.0 }
 0x260   :  { %v1021_v12 = vmax.f32 %v926_v48, 0.0 }
 0x261   :  { %v1062_v42 = vpack.c.bf16 %v1020_v40, %v1018_v36 }
 0x262   :  { %v1063_v46 = vpack.c.bf16 %v1021_v12, %v1019_v8  ;;  %v929_v16 = vpop.f32.mrb[76].mxu1 }
 0x263   :  { %v930_v20 = vadd.f32 %v929_v16, %v3275_v52  ;;  %v931_v28 = vpop.f32.mrb[77].mxu1 }
 0x264   :  { %v932_v32 = vadd.f32 %v931_v28, %v3278_v56  ;;  %v933_v49 = vpop.f32.mrb[78].mxu1  ;;  %1411 = vmatprep.mubr.bf16.mxu0 %v1063_v46 }
 0x265   :  { %v934_v50 = vadd.f32 %v933_v49, %v3275_v52  ;;  %v935_v51 = vpop.f32.mrb[79].mxu1  ;;  %1412 = vmatmul.mubr.bf16.gmra.mrb[72].mxu0 %v1062_v42  ;;  %v1022_v54 = vmax.f32 %v930_v20, 0.0 }
 0x266   :  { %v936_v53 = vadd.f32 %v935_v51, %v3278_v56  ;;  %v1023_v57 = vmax.f32 %v932_v32, 0.0 }
 0x267   :  { %v1024_v55 = vmax.f32 %v934_v50, 0.0 }
 0x268   :  { %v1025_v58 = vmax.f32 %v936_v53, 0.0 }
 0x269   :  { %v1064_v59 = vpack.c.bf16 %v1024_v55, %v1022_v54 }
 0x26a   :  { %v1065_v60 = vpack.c.bf16 %v1025_v58, %v1023_v57  ;;  %v939_v61 = vpop.f32.mrb[80].mxu1 }
 0x26b   :  { %v940_v62 = vadd.f32 %v939_v61, %v3275_v52  ;;  %v941_v63 = vpop.f32.mrb[81].mxu1  ;;  %v2877_v61 = vld [vmem:[#allocation5 + $0x390] ss:$8 sps:$4 sm:$0xff]  }
 0x26c   :  { %v942_v1 = vadd.f32 %v941_v63, %v3278_v56  ;;  %v943_v2 = vpop.f32.mrb[82].mxu1  ;;  %1421 = vmatprep.mubr.bf16.mxu0 %v1065_v60  ;;  %v2876_v60 = vld [vmem:[#allocation5 + $0x384] ss:$8 sps:$4 sm:$0xff]   ;;  %v2880_v63 = vld [vmem:[#allocation5 + $0x3a0] ss:$8 sps:$4 sm:$0xff]  }
 0x26d   :  { %v944_v3 = vadd.f32 %v943_v2, %v3275_v52  ;;  %v945_v0 = vpop.f32.mrb[83].mxu1  ;;  %1422 = vmatmul.mubr.bf16.gmra.mrb[76].mxu0 %v1064_v59  ;;  %v1026_v13 = vmax.f32 %v940_v62, 0.0  ;;  %v2874_v59 = vld [vmem:[#allocation5 + $0x380] ss:$8 sps:$4 sm:$0xff]   ;;  %2262 = vmatprep.subr.bf16.mxu0 %v2876_v60  ;;  %v2879_v62 = vld [vmem:[#allocation5 + $0x394] ss:$8 sps:$4 sm:$0xff]  }
 0x26e   :  { %v946_v10 = vadd.f32 %v945_v0, %v3278_v56  ;;  %v1027_v15 = vmax.f32 %v942_v1, 0.0  ;;  %2263 = vmatpush1.bf16.msra.mxu0 %v2874_v59  ;;  %v2882_v1 = vld [vmem:[#allocation5 + $0x3a4] ss:$8 sps:$4 sm:$0xff]   ;;  %v2883_v0 = vld [vmem:[#allocation5 + $0x3b0] ss:$8 sps:$4 sm:$0xff]  }
 0x26f   :  { %v1028_v14 = vmax.f32 %v944_v3, 0.0  ;;  %2264 = vmatprep.subr.bf16.mxu0 %v2879_v62  ;;  %v2901_v60 = vld [vmem:[#allocation5 + $0x410] ss:$8 sps:$4 sm:$0xff]  }
 0x270   :  { %v1029_v17 = vmax.f32 %v946_v10, 0.0 }
 0x271   :  { %v1066_v18 = vpack.c.bf16 %v1028_v14, %v1026_v13 }
 0x272   :  { %v1067_v19 = vpack.c.bf16 %v1029_v17, %v1027_v15  ;;  %v949_v21 = vpop.f32.mrb[84].mxu1  ;;  %2265 = vmatpush1.bf16.msra.mxu0 %v2877_v61 }
 0x273   :  { %v950_v22 = vadd.f32 %v949_v21, %v3275_v52  ;;  %v951_v23 = vpop.f32.mrb[85].mxu1  ;;  %2266 = vmatprep.subr.bf16.mxu0 %v2882_v1 }
 0x274   :  { %v952_v24 = vadd.f32 %v951_v23, %v3278_v56  ;;  %v953_v25 = vpop.f32.mrb[86].mxu1  ;;  %1431 = vmatprep.mubr.bf16.mxu0 %v1067_v19  ;;  %v2888_v19 = vld [vmem:[#allocation5 + $0x3c4] ss:$8 sps:$4 sm:$0xff]  }
 0x275   :  { %v954_v26 = vadd.f32 %v953_v25, %v3275_v52  ;;  %v955_v27 = vpop.f32.mrb[87].mxu1  ;;  %1432 = vmatmul.mubr.bf16.gmra.mrb[80].mxu0 %v1066_v18  ;;  %v1030_v30 = vmax.f32 %v950_v22, 0.0  ;;  %v2886_v18 = vld [vmem:[#allocation5 + $0x3c0] ss:$8 sps:$4 sm:$0xff]   ;;  %v2891_v22 = vld [vmem:[#allocation5 + $0x3d4] ss:$8 sps:$4 sm:$0xff]  }
 0x276   :  { %v956_v29 = vadd.f32 %v955_v27, %v3278_v56  ;;  %v1031_v33 = vmax.f32 %v952_v24, 0.0  ;;  %2267 = vmatpush1.bf16.msra.mxu0 %v2880_v63 }
 0x277   :  { %v1032_v31 = vmax.f32 %v954_v26, 0.0  ;;  %2268 = vmatprep.subr.bf16.mxu0 %v2885_v9 }
 0x278   :  { %v1033_v34 = vmax.f32 %v956_v29, 0.0  ;;  %v2889_v29 = vld [vmem:[#allocation5 + $0x3d0] ss:$8 sps:$4 sm:$0xff]  }
 0x279   :  { %v1068_v35 = vpack.c.bf16 %v1032_v31, %v1030_v30 }
 0x27a   :  { %v1069_v37 = vpack.c.bf16 %v1033_v34, %v1031_v33  ;;  %v959_v38 = vpop.f32.mrb[88].mxu1  ;;  %2269 = vmatpush1.bf16.msra.mxu0 %v2883_v0  ;;  %v2894_v33 = vld [vmem:[#allocation5 + $0x3e4] ss:$8 sps:$4 sm:$0xff]  }
 0x27b   :  { %v960_v39 = vadd.f32 %v959_v38, %v3275_v52  ;;  %v961_v41 = vpop.f32.mrb[89].mxu1  ;;  %2270 = vmatprep.subr.bf16.mxu0 %v2888_v19 }
 0x27c   :  { %v962_v43 = vadd.f32 %v961_v41, %v3278_v56  ;;  %v963_v44 = vpop.f32.mrb[90].mxu1  ;;  %1441 = vmatprep.mubr.bf16.mxu0 %v1069_v37 }
 0x27d   :  { %v964_v45 = vadd.f32 %v963_v44, %v3275_v52  ;;  %v965_v47 = vpop.f32.mrb[91].mxu1  ;;  %1442 = vmatmul.mubr.bf16.gmra.mrb[84].mxu0 %v1068_v35  ;;  %v1034_v7 = vmax.f32 %v960_v39, 0.0 }
 0x27e   :  { %v966_v6 = vadd.f32 %v965_v47, %v3278_v56  ;;  %v1035_v36 = vmax.f32 %v962_v43, 0.0  ;;  %2271 = vmatpush1.bf16.msra.mxu0 %v2886_v18  ;;  %v2892_v43 = vld [vmem:[#allocation5 + $0x3e0] ss:$8 sps:$4 sm:$0xff]  }
 0x27f   :  { %v1036_v48 = vmax.f32 %v964_v45, 0.0  ;;  %2272 = vmatprep.subr.bf16.mxu0 %v2891_v22  ;;  %v2897_v45 = vld [vmem:[#allocation5 + $0x3f4] ss:$8 sps:$4 sm:$0xff]   ;;  %v2907_v22 = vld [vmem:[#allocation5 + $0x430] ss:$8 sps:$4 sm:$0xff]  }
 0x280   :  { %v1037_v40 = vmax.f32 %v966_v6, 0.0 }
 0x281   :  { %v1070_v8 = vpack.c.bf16 %v1036_v48, %v1034_v7 }
 0x282   :  { %v1071_v12 = vpack.c.bf16 %v1037_v40, %v1035_v36  ;;  %v969_v42 = vpop.f32.mrb[92].mxu1  ;;  %2273 = vmatpush1.bf16.msra.mxu0 %v2889_v29  ;;  %v2895_v40 = vld [vmem:[#allocation5 + $0x3f0] ss:$8 sps:$4 sm:$0xff]  }
 0x283   :  { %v970_v46 = vadd.f32 %v969_v42, %v3275_v52  ;;  %v971_v16 = vpop.f32.mrb[93].mxu1  ;;  %2274 = vmatprep.subr.bf16.mxu0 %v2894_v33  ;;  %v2900_v42 = vld [vmem:[#allocation5 + $0x404] ss:$8 sps:$4 sm:$0xff]  }
 0x284   :  { %v972_v20 = vadd.f32 %v971_v16, %v3278_v56  ;;  %v973_v28 = vpop.f32.mrb[94].mxu1  ;;  %1451 = vmatprep.mubr.bf16.mxu0 %v1071_v12 }
 0x285   :  { %v974_v32 = vadd.f32 %v973_v28, %v3275_v52  ;;  %v975_v49 = vpop.f32.mrb[95].mxu1  ;;  %1452 = vmatmul.mubr.bf16.gmra.mrb[88].mxu0 %v1070_v8  ;;  %v1038_v51 = vmax.f32 %v970_v46, 0.0  ;;  %v1107_v52 = vld [vmem:[#allocation7 + $0x2] ss:$8 sm:$0x3] }
 0x286   :  { %v976_v50 = vadd.f32 %v975_v49, %v3278_v56  ;;  %v1039_v54 = vmax.f32 %v972_v20, 0.0  ;;  %v3345_v56 = vrot.slane %v1107_v52, %v3164_v4  ;;  %v3348_v2 = vrot.slane %v1107_v52, %v3166_v5  ;;  %2275 = vmatpush1.bf16.msra.mxu0 %v2892_v43  ;;  %v2906_v52 = vld [vmem:[#allocation5 + $0x424] ss:$8 sps:$4 sm:$0xff]  }
 0x287   :  { %v1040_v53 = vmax.f32 %v974_v32, 0.0  ;;  %2276 = vmatprep.subr.bf16.mxu0 %v2897_v45  ;;  %v2913_v45 = vld [vmem:[#allocation5 + $0x450] ss:$8 sps:$4 sm:$0xff]  }
 0x288   :  { %v1041_v55 = vmax.f32 %v976_v50, 0.0  ;;  %v2898_v50 = vld [vmem:[#allocation5 + $0x400] ss:$8 sps:$4 sm:$0xff]  }
 0x289   :  { %v1072_v57 = vpack.c.bf16 %v1040_v53, %v1038_v51  ;;  %v2903_v53 = vld [vmem:[#allocation5 + $0x414] ss:$8 sps:$4 sm:$0xff]  }
 0x28a   :  { %v1073_v58 = vpack.c.bf16 %v1041_v55, %v1039_v54  ;;  %2277 = vmatpush1.bf16.msra.mxu0 %v2895_v40 }
 0x28b   :  { %2278 = vmatprep.subr.bf16.mxu0 %v2900_v42 }
 0x28c   :  { %1461 = vmatprep.mubr.bf16.mxu0 %v1073_v58 }
 0x28d   :  { %1462 = vmatmul.mubr.bf16.gmra.mrb[92].mxu0 %v1072_v57 }
 0x28e   :  { %2279 = vmatpush1.bf16.msra.mxu0 %v2898_v50 }
 0x28f   :  { %2280 = vmatprep.subr.bf16.mxu0 %v2903_v53 }
 0x292   :  { %2281 = vmatpush1.bf16.msra.mxu0 %v2901_v60 }
 0x293   :  { %2282 = vmatprep.subr.bf16.mxu0 %v2906_v52 }
 0x2e8   :  { %v1313_v3 = vpop.f32.mrb[32].mxu0 }
 0x2e9   :  { %v1314_v10 = vadd.f32 %v1313_v3, %v3345_v56  ;;  %v1315_v11 = vpop.f32.mrb[33].mxu0 }
 0x2ea   :  { %v1316_v13 = vadd.f32 %v1315_v11, %v3348_v2  ;;  %v1317_v14 = vpop.f32.mrb[34].mxu0  ;;  %v2904_v11 = vld [vmem:[#allocation5 + $0x420] ss:$8 sps:$4 sm:$0xff]  }
 0x2eb   :  { %v1318_v15 = vadd.f32 %v1317_v14, %v3345_v56  ;;  %v1319_v17 = vpop.f32.mrb[35].mxu0  ;;  %v1472_v23 = vmax.f32 %v1314_v10, 0.0  ;;  %v2909_v14 = vld [vmem:[#allocation5 + $0x434] ss:$8 sps:$4 sm:$0xff]   ;;  %2283 = vmatpush1.bf16.msra.mxu0 %v2904_v11 }
 0x2ec   :  { %v1320_v21 = vadd.f32 %v1319_v17, %v3348_v2  ;;  %v1473_v25 = vmax.f32 %v1316_v13, 0.0  ;;  %2284 = vmatprep.subr.bf16.mxu0 %v2909_v14 }
 0x2ed   :  { %v1474_v24 = vmax.f32 %v1318_v15, 0.0 }
 0x2ee   :  { %v1475_v26 = vmax.f32 %v1320_v21, 0.0 }
 0x2ef   :  { %v1536_v27 = vpack.c.bf16 %v1474_v24, %v1472_v23  ;;  %2285 = vmatpush1.bf16.msra.mxu0 %v2907_v22 }
 0x2f0   :  { %v1537_v30 = vpack.c.bf16 %v1475_v26, %v1473_v25  ;;  %v1323_v31 = vpop.f32.mrb[36].mxu0  ;;  %v2912_v25 = vld [vmem:[#allocation5 + $0x444] ss:$8 sps:$4 sm:$0xff]  }
 0x2f1   :  { %v1324_v34 = vadd.f32 %v1323_v31, %v3345_v56  ;;  %v1325_v35 = vpop.f32.mrb[37].mxu0  ;;  %2286 = vmatprep.subr.bf16.mxu0 %v2912_v25 }
 0x2f2   :  { %v1326_v37 = vadd.f32 %v1325_v35, %v3348_v2  ;;  %v1327_v38 = vpop.f32.mrb[38].mxu0  ;;  %1805 = vmatprep.mubr.bf16.mxu1 %v1537_v30 }
 0x2f3   :  { %v1328_v39 = vadd.f32 %v1327_v38, %v3345_v56  ;;  %v1329_v41 = vpop.f32.mrb[39].mxu0  ;;  %1806 = vmatmul.mubr.bf16.vlgmr.msra.gmra.mrb[96].mxu1 %v1536_v27  ;;  %v1476_v47 = vmax.f32 %v1324_v34, 0.0  ;;  %v2910_v34 = vld [vmem:[#allocation5 + $0x440] ss:$8 sps:$4 sm:$0xff]  }
 0x2f4   :  { %v1330_v44 = vadd.f32 %v1329_v41, %v3348_v2  ;;  %v1477_v7 = vmax.f32 %v1326_v37, 0.0  ;;  %v2915_v37 = vld [vmem:[#allocation5 + $0x454] ss:$8 sps:$4 sm:$0xff]   ;;  %2287 = vmatpush1.bf16.msra.mxu0 %v2910_v34 }
 0x2f5   :  { %v1478_v6 = vmax.f32 %v1328_v39, 0.0  ;;  %2288 = vmatprep.subr.bf16.mxu0 %v2915_v37 }
 0x2f6   :  { %v1479_v48 = vmax.f32 %v1330_v44, 0.0 }
 0x2f7   :  { %v1538_v36 = vpack.c.bf16 %v1478_v6, %v1476_v47 }
 0x2f8   :  { %v1539_v8 = vpack.c.bf16 %v1479_v48, %v1477_v7  ;;  %v1333_v12 = vpop.f32.mrb[40].mxu0  ;;  %v2918_v7 = vld [vmem:[#allocation5 + $0x464] ss:$8 sps:$4 sm:$0xff]   ;;  %2289 = vmatpush1.bf16.msra.mxu0 %v2913_v45 }
 0x2f9   :  { %v1334_v46 = vadd.f32 %v1333_v12, %v3345_v56  ;;  %v1335_v16 = vpop.f32.mrb[41].mxu0  ;;  %2290 = vmatprep.subr.bf16.mxu0 %v2918_v7 }
 0x2fa   :  { %v1336_v20 = vadd.f32 %v1335_v16, %v3348_v2  ;;  %v1337_v28 = vpop.f32.mrb[42].mxu0  ;;  %1815 = vmatprep.mubr.bf16.mxu1 %v1539_v8 }
 0x2fb   :  { %v1338_v32 = vadd.f32 %v1337_v28, %v3345_v56  ;;  %v1339_v49 = vpop.f32.mrb[43].mxu0  ;;  %1816 = vmatmul.mubr.bf16.gmra.mrb[100].mxu1 %v1538_v36  ;;  %v1480_v54 = vmax.f32 %v1334_v46, 0.0  ;;  %v2916_v46 = vld [vmem:[#allocation5 + $0x460] ss:$8 sps:$4 sm:$0xff]  }
 0x2fc   :  { %v1340_v51 = vadd.f32 %v1339_v49, %v3348_v2  ;;  %v1481_v57 = vmax.f32 %v1336_v20, 0.0  ;;  %2291 = vmatpush1.bf16.msra.mxu0 %v2916_v46 }
 0x2fd   :  { %v1482_v55 = vmax.f32 %v1338_v32, 0.0 }
 0x2fe   :  { %v1483_v58 = vmax.f32 %v1340_v51, 0.0 }
 0x2ff   :  { %v1540_v59 = vpack.c.bf16 %v1482_v55, %v1480_v54 }
 0x300   :  { %v1541_v61 = vpack.c.bf16 %v1483_v58, %v1481_v57  ;;  %v1343_v62 = vpop.f32.mrb[44].mxu0 }
 0x301   :  { %v1344_v63 = vadd.f32 %v1343_v62, %v3345_v56  ;;  %v1345_v1 = vpop.f32.mrb[45].mxu0 }
 0x302   :  { %v1346_v3 = vadd.f32 %v1345_v1, %v3348_v2  ;;  %v1347_v0 = vpop.f32.mrb[46].mxu0  ;;  %1825 = vmatprep.mubr.bf16.mxu1 %v1541_v61 }
 0x303   :  { %v1348_v9 = vadd.f32 %v1347_v0, %v3345_v56  ;;  %v1349_v10 = vpop.f32.mrb[47].mxu0  ;;  %1826 = vmatmul.mubr.bf16.gmra.mrb[104].mxu1 %v1540_v59  ;;  %v1484_v15 = vmax.f32 %v1344_v63, 0.0 }
 0x304   :  { %v1350_v13 = vadd.f32 %v1349_v10, %v3348_v2  ;;  %v1485_v18 = vmax.f32 %v1346_v3, 0.0 }
 0x305   :  { %v1486_v17 = vmax.f32 %v1348_v9, 0.0 }
 0x306   :  { %v1487_v19 = vmax.f32 %v1350_v13, 0.0 }
 0x307   :  { %v1542_v21 = vpack.c.bf16 %v1486_v17, %v1484_v15 }
 0x308   :  { %v1543_v23 = vpack.c.bf16 %v1487_v19, %v1485_v18  ;;  %v1353_v24 = vpop.f32.mrb[48].mxu0 }
 0x309   :  { %v1354_v26 = vadd.f32 %v1353_v24, %v3345_v56  ;;  %v1355_v27 = vpop.f32.mrb[49].mxu0 }
 0x30a   :  { %v1356_v29 = vadd.f32 %v1355_v27, %v3348_v2  ;;  %v1357_v30 = vpop.f32.mrb[50].mxu0  ;;  %1835 = vmatprep.mubr.bf16.mxu1 %v1543_v23 }
 0x30b   :  { %v1358_v31 = vadd.f32 %v1357_v30, %v3345_v56  ;;  %v1359_v33 = vpop.f32.mrb[51].mxu0  ;;  %1836 = vmatmul.mubr.bf16.gmra.mrb[108].mxu1 %v1542_v21  ;;  %v1488_v38 = vmax.f32 %v1354_v26, 0.0 }
 0x30c   :  { %v1360_v35 = vadd.f32 %v1359_v33, %v3348_v2  ;;  %v1489_v41 = vmax.f32 %v1356_v29, 0.0 }
 0x30d   :  { %v1490_v39 = vmax.f32 %v1358_v31, 0.0 }
 0x30e   :  { %v1491_v43 = vmax.f32 %v1360_v35, 0.0 }
 0x30f   :  { %v1544_v44 = vpack.c.bf16 %v1490_v39, %v1488_v38 }
 0x310   :  { %v1545_v47 = vpack.c.bf16 %v1491_v43, %v1489_v41  ;;  %v1363_v6 = vpop.f32.mrb[52].mxu0 }
 0x311   :  { %v1364_v48 = vadd.f32 %v1363_v6, %v3345_v56  ;;  %v1365_v36 = vpop.f32.mrb[53].mxu0 }
 0x312   :  { %v1366_v40 = vadd.f32 %v1365_v36, %v3348_v2  ;;  %v1367_v8 = vpop.f32.mrb[54].mxu0  ;;  %1845 = vmatprep.mubr.bf16.mxu1 %v1545_v47 }
 0x313   :  { %v1368_v12 = vadd.f32 %v1367_v8, %v3345_v56  ;;  %v1369_v42 = vpop.f32.mrb[55].mxu0  ;;  %1846 = vmatmul.mubr.bf16.gmra.mrb[112].mxu1 %v1544_v44  ;;  %v1492_v20 = vmax.f32 %v1364_v48, 0.0 }
 0x314   :  { %v1370_v16 = vadd.f32 %v1369_v42, %v3348_v2  ;;  %v1493_v32 = vmax.f32 %v1366_v40, 0.0 }
 0x315   :  { %v1494_v28 = vmax.f32 %v1368_v12, 0.0 }
 0x316   :  { %v1495_v49 = vmax.f32 %v1370_v16, 0.0 }
 0x317   :  { %v1546_v50 = vpack.c.bf16 %v1494_v28, %v1492_v20 }
 0x318   :  { %v1547_v51 = vpack.c.bf16 %v1495_v49, %v1493_v32  ;;  %v1373_v53 = vpop.f32.mrb[56].mxu0 }
 0x319   :  { %v1374_v54 = vadd.f32 %v1373_v53, %v3345_v56  ;;  %v1375_v55 = vpop.f32.mrb[57].mxu0 }
 0x31a   :  { %v1376_v57 = vadd.f32 %v1375_v55, %v3348_v2  ;;  %v1377_v58 = vpop.f32.mrb[58].mxu0  ;;  %1855 = vmatprep.mubr.bf16.mxu1 %v1547_v51 }
 0x31b   :  { %v1378_v59 = vadd.f32 %v1377_v58, %v3345_v56  ;;  %v1379_v60 = vpop.f32.mrb[59].mxu0  ;;  %1856 = vmatmul.mubr.bf16.gmra.mrb[116].mxu1 %v1546_v50  ;;  %v1496_v62 = vmax.f32 %v1374_v54, 0.0 }
 0x31c   :  { %v1380_v61 = vadd.f32 %v1379_v60, %v3348_v2  ;;  %v1497_v63 = vmax.f32 %v1376_v57, 0.0 }
 0x31d   :  { %v1498_v52 = vmax.f32 %v1378_v59, 0.0 }
 0x31e   :  { %v1499_v1 = vmax.f32 %v1380_v61, 0.0 }
 0x31f   :  { %v1548_v3 = vpack.c.bf16 %v1498_v52, %v1496_v62 }
 0x320   :  { %v1549_v0 = vpack.c.bf16 %v1499_v1, %v1497_v63  ;;  %v1383_v9 = vpop.f32.mrb[60].mxu0 }
 0x321   :  { %v1384_v10 = vadd.f32 %v1383_v9, %v3345_v56  ;;  %v1385_v11 = vpop.f32.mrb[61].mxu0 }
 0x322   :  { %v1386_v13 = vadd.f32 %v1385_v11, %v3348_v2  ;;  %v1387_v14 = vpop.f32.mrb[62].mxu0  ;;  %1865 = vmatprep.mubr.bf16.mxu1 %v1549_v0 }
 0x323   :  { %v1388_v15 = vadd.f32 %v1387_v14, %v3345_v56  ;;  %v1389_v17 = vpop.f32.mrb[63].mxu0  ;;  %1866 = vmatmul.mubr.bf16.gmra.mrb[120].mxu1 %v1548_v3  ;;  %v1500_v19 = vmax.f32 %v1384_v10, 0.0 }
 0x324   :  { %v1390_v18 = vadd.f32 %v1389_v17, %v3348_v2  ;;  %v1501_v22 = vmax.f32 %v1386_v13, 0.0 }
 0x325   :  { %v1502_v21 = vmax.f32 %v1388_v15, 0.0 }
 0x326   :  { %v1503_v23 = vmax.f32 %v1390_v18, 0.0 }
 0x327   :  { %v1550_v24 = vpack.c.bf16 %v1502_v21, %v1500_v19 }
 0x328   :  { %v1551_v25 = vpack.c.bf16 %v1503_v23, %v1501_v22  ;;  %v1393_v26 = vpop.f32.mrb[64].mxu0 }
 0x329   :  { %v1394_v27 = vadd.f32 %v1393_v26, %v3345_v56  ;;  %v1395_v29 = vpop.f32.mrb[65].mxu0 }
 0x32a   :  { %v1396_v30 = vadd.f32 %v1395_v29, %v3348_v2  ;;  %v1397_v31 = vpop.f32.mrb[66].mxu0  ;;  %1875 = vmatprep.mubr.bf16.mxu1 %v1551_v25 }
 0x32b   :  { %v1398_v33 = vadd.f32 %v1397_v31, %v3345_v56  ;;  %v1399_v34 = vpop.f32.mrb[67].mxu0  ;;  %1876 = vmatmul.mubr.bf16.gmra.mrb[124].mxu1 %v1550_v24  ;;  %v1504_v37 = vmax.f32 %v1394_v27, 0.0 }
 0x32c   :  { %v1400_v35 = vadd.f32 %v1399_v34, %v3348_v2  ;;  %v1505_v39 = vmax.f32 %v1396_v30, 0.0  ;;  %v2921_v30 = vld [vmem:[#allocation5 + $0x474] ss:$8 sps:$4 sm:$0xff]  }
 0x32d   :  { %v1506_v38 = vmax.f32 %v1398_v33, 0.0  ;;  %v2919_v33 = vld [vmem:[#allocation5 + $0x470] ss:$8 sps:$4 sm:$0xff]   ;;  %2292 = vmatprep.subr.bf16.mxu0 %v2921_v30 }
 0x32e   :  { %v1507_v41 = vmax.f32 %v1400_v35, 0.0  ;;  %2293 = vmatpush1.bf16.msra.mxu0 %v2919_v33 }
 0x32f   :  { %v1552_v43 = vpack.c.bf16 %v1506_v38, %v1504_v37 }
 0x330   :  { %v1553_v44 = vpack.c.bf16 %v1507_v41, %v1505_v39  ;;  %v1403_v45 = vpop.f32.mrb[68].mxu0 }
 0x331   :  { %v1404_v47 = vadd.f32 %v1403_v45, %v3345_v56  ;;  %v1405_v6 = vpop.f32.mrb[69].mxu0 }
 0x332   :  { %v1406_v7 = vadd.f32 %v1405_v6, %v3348_v2  ;;  %v1407_v48 = vpop.f32.mrb[70].mxu0  ;;  %1885 = vmatprep.mubr.bf16.mxu1 %v1553_v44 }
 0x333   :  { %v1408_v36 = vadd.f32 %v1407_v48, %v3345_v56  ;;  %v1409_v40 = vpop.f32.mrb[71].mxu0  ;;  %1886 = vmatmul.mubr.bf16.gmra.mrb[128].mxu1 %v1552_v43  ;;  %v1508_v12 = vmax.f32 %v1404_v47, 0.0 }
 0x334   :  { %v1410_v8 = vadd.f32 %v1409_v40, %v3348_v2  ;;  %v1509_v46 = vmax.f32 %v1406_v7, 0.0 }
 0x335   :  { %v1510_v42 = vmax.f32 %v1408_v36, 0.0 }
 0x336   :  { %v1511_v16 = vmax.f32 %v1410_v8, 0.0 }
 0x337   :  { %v1554_v20 = vpack.c.bf16 %v1510_v42, %v1508_v12 }
 0x338   :  { %v1555_v28 = vpack.c.bf16 %v1511_v16, %v1509_v46  ;;  %v1413_v32 = vpop.f32.mrb[72].mxu0 }
 0x339   :  { %v1414_v49 = vadd.f32 %v1413_v32, %v3345_v56  ;;  %v1415_v50 = vpop.f32.mrb[73].mxu0 }
 0x33a   :  { %v1416_v51 = vadd.f32 %v1415_v50, %v3348_v2  ;;  %v1417_v53 = vpop.f32.mrb[74].mxu0  ;;  %1895 = vmatprep.mubr.bf16.mxu1 %v1555_v28 }
 0x33b   :  { %v1418_v54 = vadd.f32 %v1417_v53, %v3345_v56  ;;  %v1419_v55 = vpop.f32.mrb[75].mxu0  ;;  %1896 = vmatmul.mubr.bf16.gmra.mrb[132].mxu1 %v1554_v20  ;;  %v1512_v58 = vmax.f32 %v1414_v49, 0.0 }
 0x33c   :  { %v1420_v57 = vadd.f32 %v1419_v55, %v3348_v2  ;;  %v1513_v60 = vmax.f32 %v1416_v51, 0.0 }
 0x33d   :  { %v1514_v59 = vmax.f32 %v1418_v54, 0.0 }
 0x33e   :  { %v1515_v61 = vmax.f32 %v1420_v57, 0.0 }
 0x33f   :  { %v1556_v62 = vpack.c.bf16 %v1514_v59, %v1512_v58 }
 0x340   :  { %v1557_v52 = vpack.c.bf16 %v1515_v61, %v1513_v60  ;;  %v1423_v63 = vpop.f32.mrb[76].mxu0 }
 0x341   :  { %v1424_v1 = vadd.f32 %v1423_v63, %v3345_v56  ;;  %v1425_v3 = vpop.f32.mrb[77].mxu0 }
 0x342   :  { %v1426_v0 = vadd.f32 %v1425_v3, %v3348_v2  ;;  %v1427_v9 = vpop.f32.mrb[78].mxu0  ;;  %1905 = vmatprep.mubr.bf16.mxu1 %v1557_v52 }
 0x343   :  { %v1428_v10 = vadd.f32 %v1427_v9, %v3345_v56  ;;  %v1429_v11 = vpop.f32.mrb[79].mxu0  ;;  %1906 = vmatmul.mubr.bf16.gmra.mrb[136].mxu1 %v1556_v62  ;;  %v1516_v14 = vmax.f32 %v1424_v1, 0.0 }
 0x344   :  { %v1430_v13 = vadd.f32 %v1429_v11, %v3348_v2  ;;  %v1517_v17 = vmax.f32 %v1426_v0, 0.0 }
 0x345   :  { %v1518_v15 = vmax.f32 %v1428_v10, 0.0 }
 0x346   :  { %v1519_v18 = vmax.f32 %v1430_v13, 0.0 }
 0x347   :  { %v1558_v19 = vpack.c.bf16 %v1518_v15, %v1516_v14 }
 0x348   :  { %v1559_v21 = vpack.c.bf16 %v1519_v18, %v1517_v17  ;;  %v1433_v22 = vpop.f32.mrb[80].mxu0 }
 0x349   :  { %v1434_v23 = vadd.f32 %v1433_v22, %v3345_v56  ;;  %v1435_v24 = vpop.f32.mrb[81].mxu0 }
 0x34a   :  { %v1436_v25 = vadd.f32 %v1435_v24, %v3348_v2  ;;  %v1437_v26 = vpop.f32.mrb[82].mxu0  ;;  %1915 = vmatprep.mubr.bf16.mxu1 %v1559_v21 }
 0x34b   :  { %v1438_v27 = vadd.f32 %v1437_v26, %v3345_v56  ;;  %v1439_v29 = vpop.f32.mrb[83].mxu0  ;;  %1916 = vmatmul.mubr.bf16.gmra.mrb[140].mxu1 %v1558_v19  ;;  %v1520_v34 = vmax.f32 %v1434_v23, 0.0  ;;  %v1601_v19 = vld [vmem:[#allocation7 + $0x3] ss:$8 sm:$0x3] }
 0x34c   :  { %v1440_v31 = vadd.f32 %v1439_v29, %v3348_v2  ;;  %v1521_v37 = vmax.f32 %v1436_v25, 0.0  ;;  %v3415_v21 = vrot.slane %v1601_v19, %v3164_v4  ;;  %v3418_v22 = vrot.slane %v1601_v19, %v3166_v5 }
 0x34d   :  { %v1522_v35 = vmax.f32 %v1438_v27, 0.0 }
 0x34e   :  { %v1523_v38 = vmax.f32 %v1440_v31, 0.0 }
 0x34f   :  { %v1560_v39 = vpack.c.bf16 %v1522_v35, %v1520_v34 }
 0x350   :  { %v1561_v41 = vpack.c.bf16 %v1523_v38, %v1521_v37  ;;  %v1443_v43 = vpop.f32.mrb[84].mxu0 }
 0x351   :  { %v1444_v44 = vadd.f32 %v1443_v43, %v3345_v56  ;;  %v1445_v45 = vpop.f32.mrb[85].mxu0 }
 0x352   :  { %v1446_v47 = vadd.f32 %v1445_v45, %v3348_v2  ;;  %v1447_v6 = vpop.f32.mrb[86].mxu0  ;;  %1925 = vmatprep.mubr.bf16.mxu1 %v1561_v41 }
 0x353   :  { %v1448_v7 = vadd.f32 %v1447_v6, %v3345_v56  ;;  %v1449_v48 = vpop.f32.mrb[87].mxu0  ;;  %1926 = vmatmul.mubr.bf16.gmra.mrb[144].mxu1 %v1560_v39  ;;  %v1524_v40 = vmax.f32 %v1444_v44, 0.0 }
 0x354   :  { %v1450_v36 = vadd.f32 %v1449_v48, %v3348_v2  ;;  %v1525_v12 = vmax.f32 %v1446_v47, 0.0 }
 0x355   :  { %v1526_v8 = vmax.f32 %v1448_v7, 0.0 }
 0x356   :  { %v1527_v42 = vmax.f32 %v1450_v36, 0.0 }
 0x357   :  { %v1562_v46 = vpack.c.bf16 %v1526_v8, %v1524_v40 }
 0x358   :  { %v1563_v16 = vpack.c.bf16 %v1527_v42, %v1525_v12  ;;  %v1453_v20 = vpop.f32.mrb[88].mxu0 }
 0x359   :  { %v1454_v28 = vadd.f32 %v1453_v20, %v3345_v56  ;;  %v1455_v32 = vpop.f32.mrb[89].mxu0 }
 0x35a   :  { %v1456_v49 = vadd.f32 %v1455_v32, %v3348_v2  ;;  %v1457_v50 = vpop.f32.mrb[90].mxu0  ;;  %1935 = vmatprep.mubr.bf16.mxu1 %v1563_v16 }
 0x35b   :  { %v1458_v51 = vadd.f32 %v1457_v50, %v3345_v56  ;;  %v1459_v53 = vpop.f32.mrb[91].mxu0  ;;  %1936 = vmatmul.mubr.bf16.gmra.mrb[148].mxu1 %v1562_v46  ;;  %v1528_v55 = vmax.f32 %v1454_v28, 0.0 }
 0x35c   :  { %v1460_v54 = vadd.f32 %v1459_v53, %v3348_v2  ;;  %v1529_v58 = vmax.f32 %v1456_v49, 0.0 }
 0x35d   :  { %v1530_v57 = vmax.f32 %v1458_v51, 0.0 }
 0x35e   :  { %v1531_v59 = vmax.f32 %v1460_v54, 0.0 }
 0x35f   :  { %v1564_v60 = vpack.c.bf16 %v1530_v57, %v1528_v55 }
 0x360   :  { %v1565_v61 = vpack.c.bf16 %v1531_v59, %v1529_v58  ;;  %v1463_v62 = vpop.f32.mrb[92].mxu0 }
 0x361   :  { %v1464_v52 = vadd.f32 %v1463_v62, %v3345_v56  ;;  %v1465_v63 = vpop.f32.mrb[93].mxu0 }
 0x362   :  { %v1466_v1 = vadd.f32 %v1465_v63, %v3348_v2  ;;  %v1467_v3 = vpop.f32.mrb[94].mxu0  ;;  %1945 = vmatprep.mubr.bf16.mxu1 %v1565_v61 }
 0x363   :  { %v1468_v0 = vadd.f32 %v1467_v3, %v3345_v56  ;;  %v1469_v9 = vpop.f32.mrb[95].mxu0  ;;  %1946 = vmatmul.mubr.bf16.gmra.mrb[152].mxu1 %v1564_v60  ;;  %v1532_v11 = vmax.f32 %v1464_v52, 0.0 }
 0x364   :  { %v1470_v10 = vadd.f32 %v1469_v9, %v3348_v2  ;;  %v1533_v14 = vmax.f32 %v1466_v1, 0.0 }
 0x365   :  { %v1534_v13 = vmax.f32 %v1468_v0, 0.0 }
 0x366   :  { %v1535_v15 = vmax.f32 %v1470_v10, 0.0 }
 0x367   :  { %v1566_v17 = vpack.c.bf16 %v1534_v13, %v1532_v11 }
 0x368   :  { %v1567_v18 = vpack.c.bf16 %v1535_v15, %v1533_v14 }
 0x36a   :  { %1955 = vmatprep.mubr.bf16.mxu1 %v1567_v18 }
 0x36b   :  { %1956 = vmatmul.mubr.bf16.gmra.mrb[156].mxu1 %v1566_v17 }
 0x3c6   :  { %v1807_v56 = vpop.f32.mrb[96].mxu1 }
 0x3c7   :  { %v1808_v23 = vadd.f32 %v1807_v56, %v3415_v21  ;;  %v1809_v24 = vpop.f32.mrb[97].mxu1 }
 0x3c8   :  { %v1810_v2 = vadd.f32 %v1809_v24, %v3418_v22  ;;  %v1811_v25 = vpop.f32.mrb[98].mxu1 }
 0x3c9   :  { %v1812_v26 = vadd.f32 %v1811_v25, %v3415_v21  ;;  %v1813_v27 = vpop.f32.mrb[99].mxu1  ;;  %v1966_v30 = vmax.f32 %v1808_v23, 0.0 }
 0x3ca   :  { %v1814_v29 = vadd.f32 %v1813_v27, %v3418_v22  ;;  %v1967_v33 = vmax.f32 %v1810_v2, 0.0 }
 0x3cb   :  { %v1968_v31 = vmax.f32 %v1812_v26, 0.0 }
 0x3cc   :  { %v1969_v34 = vmax.f32 %v1814_v29, 0.0 }
 0x3cd   :  { %v2030_v35 = vpack.c.bf16 %v1968_v31, %v1966_v30 }
 0x3ce   :  { %v2031_v37 = vpack.c.bf16 %v1969_v34, %v1967_v33  ;;  %v1817_v5 = vpop.f32.mrb[100].mxu1 }
 0x3cf   :  { %v1818_v38 = vadd.f32 %v1817_v5, %v3415_v21  ;;  %v1819_v39 = vpop.f32.mrb[101].mxu1 }
 0x3d0   :  { %v1820_v41 = vadd.f32 %v1819_v39, %v3418_v22  ;;  %v1821_v43 = vpop.f32.mrb[102].mxu1  ;;  %2294 = vmatprep.mubr.bf16.mxu0 %v2031_v37 }
 0x3d1   :  { %v1822_v44 = vadd.f32 %v1821_v43, %v3415_v21  ;;  %v1823_v45 = vpop.f32.mrb[103].mxu1  ;;  %2295 = vmatmul.mubr.bf16.vlgmr.msra.gmra.mrb[96].mxu0 %v2030_v35  ;;  %v1970_v6 = vmax.f32 %v1818_v38, 0.0 }
 0x3d2   :  { %v1824_v47 = vadd.f32 %v1823_v45, %v3418_v22  ;;  %v1971_v48 = vmax.f32 %v1820_v41, 0.0 }
 0x3d3   :  { %v1972_v7 = vmax.f32 %v1822_v44, 0.0 }
 0x3d4   :  { %v1973_v36 = vmax.f32 %v1824_v47, 0.0 }
 0x3d5   :  { %v2032_v40 = vpack.c.bf16 %v1972_v7, %v1970_v6 }
 0x3d6   :  { %v2033_v8 = vpack.c.bf16 %v1973_v36, %v1971_v48  ;;  %v1827_v12 = vpop.f32.mrb[104].mxu1 }
 0x3d7   :  { %v1828_v42 = vadd.f32 %v1827_v12, %v3415_v21  ;;  %v1829_v46 = vpop.f32.mrb[105].mxu1 }
 0x3d8   :  { %v1830_v16 = vadd.f32 %v1829_v46, %v3418_v22  ;;  %v1831_v20 = vpop.f32.mrb[106].mxu1  ;;  %2302 = vmatprep.mubr.bf16.mxu0 %v2033_v8 }
 0x3d9   :  { %v1832_v28 = vadd.f32 %v1831_v20, %v3415_v21  ;;  %v1833_v32 = vpop.f32.mrb[107].mxu1  ;;  %2303 = vmatmul.mubr.bf16.gmra.mrb[100].mxu0 %v2032_v40  ;;  %v1974_v50 = vmax.f32 %v1828_v42, 0.0 }
 0x3da   :  { %v1834_v49 = vadd.f32 %v1833_v32, %v3418_v22  ;;  %v1975_v53 = vmax.f32 %v1830_v16, 0.0 }
 0x3db   :  { %v1976_v51 = vmax.f32 %v1832_v28, 0.0 }
 0x3dc   :  { %v1977_v54 = vmax.f32 %v1834_v49, 0.0 }
 0x3dd   :  { %v2034_v55 = vpack.c.bf16 %v1976_v51, %v1974_v50 }
 0x3de   :  { %v2035_v57 = vpack.c.bf16 %v1977_v54, %v1975_v53  ;;  %v1837_v58 = vpop.f32.mrb[108].mxu1 }
 0x3df   :  { %v1838_v59 = vadd.f32 %v1837_v58, %v3415_v21  ;;  %v1839_v60 = vpop.f32.mrb[109].mxu1 }
 0x3e0   :  { %v1840_v61 = vadd.f32 %v1839_v60, %v3418_v22  ;;  %v1841_v62 = vpop.f32.mrb[110].mxu1  ;;  %2310 = vmatprep.mubr.bf16.mxu0 %v2035_v57 }
 0x3e1   :  { %v1842_v52 = vadd.f32 %v1841_v62, %v3415_v21  ;;  %v1843_v63 = vpop.f32.mrb[111].mxu1  ;;  %2311 = vmatmul.mubr.bf16.gmra.mrb[104].mxu0 %v2034_v55  ;;  %v1978_v3 = vmax.f32 %v1838_v59, 0.0 }
 0x3e2   :  { %v1844_v1 = vadd.f32 %v1843_v63, %v3418_v22  ;;  %v1979_v9 = vmax.f32 %v1840_v61, 0.0 }
 0x3e3   :  { %v1980_v0 = vmax.f32 %v1842_v52, 0.0 }
 0x3e4   :  { %v1981_v10 = vmax.f32 %v1844_v1, 0.0 }
 0x3e5   :  { %v2036_v11 = vpack.c.bf16 %v1980_v0, %v1978_v3 }
 0x3e6   :  { %v2037_v13 = vpack.c.bf16 %v1981_v10, %v1979_v9  ;;  %v1847_v14 = vpop.f32.mrb[112].mxu1 }
 0x3e7   :  { %v1848_v15 = vadd.f32 %v1847_v14, %v3415_v21  ;;  %v1849_v17 = vpop.f32.mrb[113].mxu1 }
 0x3e8   :  { %v1850_v18 = vadd.f32 %v1849_v17, %v3418_v22  ;;  %v1851_v19 = vpop.f32.mrb[114].mxu1  ;;  %2318 = vmatprep.mubr.bf16.mxu0 %v2037_v13 }
 0x3e9   :  { %v1852_v56 = vadd.f32 %v1851_v19, %v3415_v21  ;;  %v1853_v23 = vpop.f32.mrb[115].mxu1  ;;  %2319 = vmatmul.mubr.bf16.gmra.mrb[108].mxu0 %v2036_v11  ;;  %v1982_v2 = vmax.f32 %v1848_v15, 0.0 }
 0x3ea   :  { %v1854_v24 = vadd.f32 %v1853_v23, %v3418_v22  ;;  %v1983_v26 = vmax.f32 %v1850_v18, 0.0 }
 0x3eb   :  { %v1984_v25 = vmax.f32 %v1852_v56, 0.0 }
 0x3ec   :  { %v1985_v27 = vmax.f32 %v1854_v24, 0.0 }
 0x3ed   :  { %v2038_v29 = vpack.c.bf16 %v1984_v25, %v1982_v2 }
 0x3ee   :  { %v2039_v30 = vpack.c.bf16 %v1985_v27, %v1983_v26  ;;  %v1857_v31 = vpop.f32.mrb[116].mxu1 }
 0x3ef   :  { %v1858_v33 = vadd.f32 %v1857_v31, %v3415_v21  ;;  %v1859_v34 = vpop.f32.mrb[117].mxu1 }
 0x3f0   :  { %v1860_v35 = vadd.f32 %v1859_v34, %v3418_v22  ;;  %v1861_v37 = vpop.f32.mrb[118].mxu1  ;;  %2326 = vmatprep.mubr.bf16.mxu0 %v2039_v30 }
 0x3f1   :  { %v1862_v5 = vadd.f32 %v1861_v37, %v3415_v21  ;;  %v1863_v38 = vpop.f32.mrb[119].mxu1  ;;  %2327 = vmatmul.mubr.bf16.gmra.mrb[112].mxu0 %v2038_v29  ;;  %v1986_v41 = vmax.f32 %v1858_v33, 0.0 }
 0x3f2   :  { %v1864_v39 = vadd.f32 %v1863_v38, %v3418_v22  ;;  %v1987_v44 = vmax.f32 %v1860_v35, 0.0 }
 0x3f3   :  { %v1988_v43 = vmax.f32 %v1862_v5, 0.0 }
 0x3f4   :  { %v1989_v45 = vmax.f32 %v1864_v39, 0.0 }
 0x3f5   :  { %v2040_v47 = vpack.c.bf16 %v1988_v43, %v1986_v41 }
 0x3f6   :  { %v2041_v6 = vpack.c.bf16 %v1989_v45, %v1987_v44  ;;  %v1867_v7 = vpop.f32.mrb[120].mxu1 }
 0x3f7   :  { %v1868_v48 = vadd.f32 %v1867_v7, %v3415_v21  ;;  %v1869_v36 = vpop.f32.mrb[121].mxu1 }
 0x3f8   :  { %v1870_v40 = vadd.f32 %v1869_v36, %v3418_v22  ;;  %v1871_v8 = vpop.f32.mrb[122].mxu1  ;;  %2334 = vmatprep.mubr.bf16.mxu0 %v2041_v6 }
 0x3f9   :  { %v1872_v12 = vadd.f32 %v1871_v8, %v3415_v21  ;;  %v1873_v42 = vpop.f32.mrb[123].mxu1  ;;  %2335 = vmatmul.mubr.bf16.gmra.mrb[116].mxu0 %v2040_v47  ;;  %v1990_v16 = vmax.f32 %v1868_v48, 0.0 }
 0x3fa   :  { %v1874_v46 = vadd.f32 %v1873_v42, %v3418_v22  ;;  %v1991_v28 = vmax.f32 %v1870_v40, 0.0 }
 0x3fb   :  { %v1992_v20 = vmax.f32 %v1872_v12, 0.0 }
 0x3fc   :  { %v1993_v32 = vmax.f32 %v1874_v46, 0.0 }
 0x3fd   :  { %v2042_v49 = vpack.c.bf16 %v1992_v20, %v1990_v16 }
 0x3fe   :  { %v2043_v50 = vpack.c.bf16 %v1993_v32, %v1991_v28  ;;  %v1877_v51 = vpop.f32.mrb[124].mxu1 }
 0x3ff   :  { %v1878_v53 = vadd.f32 %v1877_v51, %v3415_v21  ;;  %v1879_v54 = vpop.f32.mrb[125].mxu1 }
 0x400   :  { %v1880_v55 = vadd.f32 %v1879_v54, %v3418_v22  ;;  %v1881_v57 = vpop.f32.mrb[126].mxu1  ;;  %2342 = vmatprep.mubr.bf16.mxu0 %v2043_v50 }
 0x401   :  { %v1882_v58 = vadd.f32 %v1881_v57, %v3415_v21  ;;  %v1883_v59 = vpop.f32.mrb[127].mxu1  ;;  %2343 = vmatmul.mubr.bf16.gmra.mrb[120].mxu0 %v2042_v49  ;;  %v1994_v61 = vmax.f32 %v1878_v53, 0.0 }
 0x402   :  { %v1884_v60 = vadd.f32 %v1883_v59, %v3418_v22  ;;  %v1995_v52 = vmax.f32 %v1880_v55, 0.0 }
 0x403   :  { %v1996_v62 = vmax.f32 %v1882_v58, 0.0 }
 0x404   :  { %v1997_v63 = vmax.f32 %v1884_v60, 0.0 }
 0x405   :  { %v2044_v1 = vpack.c.bf16 %v1996_v62, %v1994_v61 }
 0x406   :  { %v2045_v3 = vpack.c.bf16 %v1997_v63, %v1995_v52  ;;  %v1887_v0 = vpop.f32.mrb[128].mxu1 }
 0x407   :  { %v1888_v9 = vadd.f32 %v1887_v0, %v3415_v21  ;;  %v1889_v10 = vpop.f32.mrb[129].mxu1 }
 0x408   :  { %v1890_v11 = vadd.f32 %v1889_v10, %v3418_v22  ;;  %v1891_v13 = vpop.f32.mrb[130].mxu1  ;;  %2350 = vmatprep.mubr.bf16.mxu0 %v2045_v3 }
 0x409   :  { %v1892_v14 = vadd.f32 %v1891_v13, %v3415_v21  ;;  %v1893_v15 = vpop.f32.mrb[131].mxu1  ;;  %2351 = vmatmul.mubr.bf16.gmra.mrb[124].mxu0 %v2044_v1  ;;  %v1998_v18 = vmax.f32 %v1888_v9, 0.0 }
 0x40a   :  { %v1894_v17 = vadd.f32 %v1893_v15, %v3418_v22  ;;  %v1999_v56 = vmax.f32 %v1890_v11, 0.0 }
 0x40b   :  { %v2000_v19 = vmax.f32 %v1892_v14, 0.0 }
 0x40c   :  { %v2001_v23 = vmax.f32 %v1894_v17, 0.0 }
 0x40d   :  { %v2046_v24 = vpack.c.bf16 %v2000_v19, %v1998_v18 }
 0x40e   :  { %v2047_v2 = vpack.c.bf16 %v2001_v23, %v1999_v56  ;;  %v1897_v25 = vpop.f32.mrb[132].mxu1 }
 0x40f   :  { %v1898_v26 = vadd.f32 %v1897_v25, %v3415_v21  ;;  %v1899_v27 = vpop.f32.mrb[133].mxu1 }
 0x410   :  { %v1900_v29 = vadd.f32 %v1899_v27, %v3418_v22  ;;  %v1901_v30 = vpop.f32.mrb[134].mxu1  ;;  %2358 = vmatprep.mubr.bf16.mxu0 %v2047_v2 }
 0x411   :  { %v1902_v31 = vadd.f32 %v1901_v30, %v3415_v21  ;;  %v1903_v33 = vpop.f32.mrb[135].mxu1  ;;  %2359 = vmatmul.mubr.bf16.gmra.mrb[128].mxu0 %v2046_v24  ;;  %v2002_v35 = vmax.f32 %v1898_v26, 0.0 }
 0x412   :  { %v1904_v34 = vadd.f32 %v1903_v33, %v3418_v22  ;;  %v2003_v5 = vmax.f32 %v1900_v29, 0.0 }
 0x413   :  { %v2004_v37 = vmax.f32 %v1902_v31, 0.0 }
 0x414   :  { %v2005_v38 = vmax.f32 %v1904_v34, 0.0 }
 0x415   :  { %v2048_v39 = vpack.c.bf16 %v2004_v37, %v2002_v35 }
 0x416   :  { %v2049_v41 = vpack.c.bf16 %v2005_v38, %v2003_v5  ;;  %v1907_v43 = vpop.f32.mrb[136].mxu1 }
 0x417   :  { %v1908_v44 = vadd.f32 %v1907_v43, %v3415_v21  ;;  %v1909_v45 = vpop.f32.mrb[137].mxu1 }
 0x418   :  { %v1910_v47 = vadd.f32 %v1909_v45, %v3418_v22  ;;  %v1911_v6 = vpop.f32.mrb[138].mxu1  ;;  %2366 = vmatprep.mubr.bf16.mxu0 %v2049_v41 }
 0x419   :  { %v1912_v7 = vadd.f32 %v1911_v6, %v3415_v21  ;;  %v1913_v48 = vpop.f32.mrb[139].mxu1  ;;  %2367 = vmatmul.mubr.bf16.gmra.mrb[132].mxu0 %v2048_v39  ;;  %v2006_v40 = vmax.f32 %v1908_v44, 0.0 }
 0x41a   :  { %v1914_v36 = vadd.f32 %v1913_v48, %v3418_v22  ;;  %v2007_v12 = vmax.f32 %v1910_v47, 0.0 }
 0x41b   :  { %v2008_v8 = vmax.f32 %v1912_v7, 0.0 }
 0x41c   :  { %v2009_v42 = vmax.f32 %v1914_v36, 0.0 }
 0x41d   :  { %v2050_v46 = vpack.c.bf16 %v2008_v8, %v2006_v40 }
 0x41e   :  { %v2051_v16 = vpack.c.bf16 %v2009_v42, %v2007_v12  ;;  %v1917_v20 = vpop.f32.mrb[140].mxu1 }
 0x41f   :  { %v1918_v28 = vadd.f32 %v1917_v20, %v3415_v21  ;;  %v1919_v32 = vpop.f32.mrb[141].mxu1 }
 0x420   :  { %v1920_v49 = vadd.f32 %v1919_v32, %v3418_v22  ;;  %v1921_v50 = vpop.f32.mrb[142].mxu1  ;;  %2374 = vmatprep.mubr.bf16.mxu0 %v2051_v16 }
 0x421   :  { %v1922_v51 = vadd.f32 %v1921_v50, %v3415_v21  ;;  %v1923_v53 = vpop.f32.mrb[143].mxu1  ;;  %2375 = vmatmul.mubr.bf16.gmra.mrb[136].mxu0 %v2050_v46  ;;  %v2010_v55 = vmax.f32 %v1918_v28, 0.0 }
 0x422   :  { %v1924_v54 = vadd.f32 %v1923_v53, %v3418_v22  ;;  %v2011_v58 = vmax.f32 %v1920_v49, 0.0 }
 0x423   :  { %v2012_v57 = vmax.f32 %v1922_v51, 0.0 }
 0x424   :  { %v2013_v59 = vmax.f32 %v1924_v54, 0.0 }
 0x425   :  { %v2052_v60 = vpack.c.bf16 %v2012_v57, %v2010_v55  ;;  %v2095_v57 = vld [vmem:[#allocation7 + $0x4] ss:$8 sm:$0x3] }
 0x426   :  { %v2053_v61 = vpack.c.bf16 %v2013_v59, %v2011_v58  ;;  %v1927_v62 = vpop.f32.mrb[144].mxu1  ;;  %v3485_v58 = vrot.slane %v2095_v57, %v3164_v4 }
 0x427   :  { %v1928_v52 = vadd.f32 %v1927_v62, %v3415_v21  ;;  %v1929_v63 = vpop.f32.mrb[145].mxu1 }
 0x428   :  { %v1930_v1 = vadd.f32 %v1929_v63, %v3418_v22  ;;  %v1931_v3 = vpop.f32.mrb[146].mxu1  ;;  %2382 = vmatprep.mubr.bf16.mxu0 %v2053_v61 }
 0x429   :  { %v1932_v0 = vadd.f32 %v1931_v3, %v3415_v21  ;;  %v1933_v9 = vpop.f32.mrb[147].mxu1  ;;  %2383 = vmatmul.mubr.bf16.gmra.mrb[140].mxu0 %v2052_v60  ;;  %v2014_v11 = vmax.f32 %v1928_v52, 0.0 }
 0x42a   :  { %v1934_v10 = vadd.f32 %v1933_v9, %v3418_v22  ;;  %v2015_v14 = vmax.f32 %v1930_v1, 0.0 }
 0x42b   :  { %v2016_v13 = vmax.f32 %v1932_v0, 0.0 }
 0x42c   :  { %v2017_v15 = vmax.f32 %v1934_v10, 0.0 }
 0x42d   :  { %v2054_v17 = vpack.c.bf16 %v2016_v13, %v2014_v11 }
 0x42e   :  { %v2055_v18 = vpack.c.bf16 %v2017_v15, %v2015_v14  ;;  %v1937_v19 = vpop.f32.mrb[148].mxu1 }
 0x42f   :  { %v1938_v56 = vadd.f32 %v1937_v19, %v3415_v21  ;;  %v1939_v23 = vpop.f32.mrb[149].mxu1 }
 0x430   :  { %v1940_v24 = vadd.f32 %v1939_v23, %v3418_v22  ;;  %v1941_v2 = vpop.f32.mrb[150].mxu1  ;;  %2390 = vmatprep.mubr.bf16.mxu0 %v2055_v18 }
 0x431   :  { %v1942_v25 = vadd.f32 %v1941_v2, %v3415_v21  ;;  %v1943_v26 = vpop.f32.mrb[151].mxu1  ;;  %2391 = vmatmul.mubr.bf16.gmra.mrb[144].mxu0 %v2054_v17  ;;  %v2018_v29 = vmax.f32 %v1938_v56, 0.0 }
 0x432   :  { %v1944_v27 = vadd.f32 %v1943_v26, %v3418_v22  ;;  %v2019_v31 = vmax.f32 %v1940_v24, 0.0 }
 0x433   :  { %v2020_v30 = vmax.f32 %v1942_v25, 0.0 }
 0x434   :  { %v2021_v33 = vmax.f32 %v1944_v27, 0.0 }
 0x435   :  { %v2056_v34 = vpack.c.bf16 %v2020_v30, %v2018_v29 }
 0x436   :  { %v2057_v35 = vpack.c.bf16 %v2021_v33, %v2019_v31  ;;  %v1947_v37 = vpop.f32.mrb[152].mxu1 }
 0x437   :  { %v1948_v5 = vadd.f32 %v1947_v37, %v3415_v21  ;;  %v1949_v38 = vpop.f32.mrb[153].mxu1 }
 0x438   :  { %v1950_v39 = vadd.f32 %v1949_v38, %v3418_v22  ;;  %v1951_v41 = vpop.f32.mrb[154].mxu1  ;;  %2398 = vmatprep.mubr.bf16.mxu0 %v2057_v35 }
 0x439   :  { %v1952_v43 = vadd.f32 %v1951_v41, %v3415_v21  ;;  %v1953_v44 = vpop.f32.mrb[155].mxu1  ;;  %2399 = vmatmul.mubr.bf16.gmra.mrb[148].mxu0 %v2056_v34  ;;  %v2022_v47 = vmax.f32 %v1948_v5, 0.0 }
 0x43a   :  { %v1954_v45 = vadd.f32 %v1953_v44, %v3418_v22  ;;  %v2023_v7 = vmax.f32 %v1950_v39, 0.0 }
 0x43b   :  { %v2024_v6 = vmax.f32 %v1952_v43, 0.0 }
 0x43c   :  { %v2025_v48 = vmax.f32 %v1954_v45, 0.0 }
 0x43d   :  { %v2058_v36 = vpack.c.bf16 %v2024_v6, %v2022_v47 }
 0x43e   :  { %v2059_v40 = vpack.c.bf16 %v2025_v48, %v2023_v7  ;;  %v1957_v8 = vpop.f32.mrb[156].mxu1 }
 0x43f   :  { %v1958_v12 = vadd.f32 %v1957_v8, %v3415_v21  ;;  %v1959_v42 = vpop.f32.mrb[157].mxu1 }
 0x440   :  { %v1960_v46 = vadd.f32 %v1959_v42, %v3418_v22  ;;  %v1961_v16 = vpop.f32.mrb[158].mxu1  ;;  %2406 = vmatprep.mubr.bf16.mxu0 %v2059_v40 }
 0x441   :  { %v1962_v20 = vadd.f32 %v1961_v16, %v3415_v21  ;;  %v1963_v28 = vpop.f32.mrb[159].mxu1  ;;  %2407 = vmatmul.mubr.bf16.gmra.mrb[152].mxu0 %v2058_v36  ;;  %v2026_v49 = vmax.f32 %v1958_v12, 0.0 }
 0x442   :  { %v1964_v32 = vadd.f32 %v1963_v28, %v3418_v22  ;;  %v2027_v51 = vmax.f32 %v1960_v46, 0.0 }
 0x443   :  { %v2028_v50 = vmax.f32 %v1962_v20, 0.0 }
 0x444   :  { %v2029_v53 = vmax.f32 %v1964_v32, 0.0 }
 0x445   :  { %v2060_v54 = vpack.c.bf16 %v2028_v50, %v2026_v49 }
 0x446   :  { %v2061_v55 = vpack.c.bf16 %v2029_v53, %v2027_v51 }
 0x448   :  { %2414 = vmatprep.mubr.bf16.mxu0 %v2061_v55 }
 0x449   :  { %2415 = vmatmul.mubr.bf16.gmra.mrb[156].mxu0 %v2060_v54 }
 0x4a4   :  { %v2296_v59 = vpop.f32.mrb[96].mxu0 }
 0x4a5   :  { %v2297_v60 = vadd.f32 %v2296_v59, %v3485_v58  ;;  %v2298_v21 = vpop.f32.mrb[97].mxu0 }
 0x4a6   :  { %v2299_v61 = vpop.f32.mrb[98].mxu0 }
 0x4a7   :  { %2922 = vtanh.f32 %v2297_v60  ;;  %v2300_v22 = vadd.f32 %v2299_v61, %v3485_v58  ;;  %v2301_v62 = vpop.f32.mrb[99].mxu0 }
 0x4a9   :  { %2924 = vtanh.f32 %v2300_v22 }
 0x4ac   :  { %v2304_v52 = vpop.f32.mrb[100].mxu0 }
 0x4ad   :  { %v2305_v63 = vadd.f32 %v2304_v52, %v3485_v58  ;;  %v2306_v1 = vpop.f32.mrb[101].mxu0 }
 0x4ae   :  { %v2307_v3 = vpop.f32.mrb[102].mxu0 }
 0x4af   :  { %2926 = vtanh.f32 %v2305_v63  ;;  %v2308_v0 = vadd.f32 %v2307_v3, %v3485_v58  ;;  %v2309_v4 = vpop.f32.mrb[103].mxu0 }
 0x4b1   :  { %v2923_v9 = vpop.eup %2922  ;;  %2928 = vtanh.f32 %v2308_v0 }
 0x4b2   :  { %2455 = vst [vmem:[#allocation8] sm:$0xff] %v2923_v9 }
 0x4b3   :  { %v2925_v10 = vpop.eup %2924 }
 0x4b4   :  { %2456 = vst [vmem:[#allocation8 + $0x8] sm:$0xff] %v2925_v10  ;;  %v2312_v11 = vpop.f32.mrb[104].mxu0 }
 0x4b5   :  { %v2313_v13 = vadd.f32 %v2312_v11, %v3485_v58  ;;  %v2314_v14 = vpop.f32.mrb[105].mxu0 }
 0x4b6   :  { %v2315_v15 = vpop.f32.mrb[106].mxu0 }
 0x4b7   :  { %2930 = vtanh.f32 %v2313_v13  ;;  %v2316_v17 = vadd.f32 %v2315_v15, %v3485_v58  ;;  %v2317_v18 = vpop.f32.mrb[107].mxu0 }
 0x4b9   :  { %v2927_v19 = vpop.eup %2926  ;;  %2932 = vtanh.f32 %v2316_v17 }
 0x4ba   :  { %2457 = vst [vmem:[#allocation8 + $0x10] sm:$0xff] %v2927_v19 }
 0x4bb   :  { %v2929_v56 = vpop.eup %2928 }
 0x4bc   :  { %2458 = vst [vmem:[#allocation8 + $0x18] sm:$0xff] %v2929_v56  ;;  %v2320_v23 = vpop.f32.mrb[108].mxu0 }
 0x4bd   :  { %v2321_v24 = vadd.f32 %v2320_v23, %v3485_v58  ;;  %v2322_v2 = vpop.f32.mrb[109].mxu0 }
 0x4be   :  { %v2323_v25 = vpop.f32.mrb[110].mxu0 }
 0x4bf   :  { %2934 = vtanh.f32 %v2321_v24  ;;  %v2324_v26 = vadd.f32 %v2323_v25, %v3485_v58  ;;  %v2325_v27 = vpop.f32.mrb[111].mxu0 }
 0x4c1   :  { %v2931_v29 = vpop.eup %2930  ;;  %2936 = vtanh.f32 %v2324_v26 }
 0x4c2   :  { %2459 = vst [vmem:[#allocation8 + $0x20] sm:$0xff] %v2931_v29 }
 0x4c3   :  { %v2933_v30 = vpop.eup %2932 }
 0x4c4   :  { %2460 = vst [vmem:[#allocation8 + $0x28] sm:$0xff] %v2933_v30  ;;  %v2328_v31 = vpop.f32.mrb[112].mxu0 }
 0x4c5   :  { %v2329_v33 = vadd.f32 %v2328_v31, %v3485_v58  ;;  %v2330_v34 = vpop.f32.mrb[113].mxu0 }
 0x4c6   :  { %v2331_v35 = vpop.f32.mrb[114].mxu0 }
 0x4c7   :  { %2938 = vtanh.f32 %v2329_v33  ;;  %v2332_v37 = vadd.f32 %v2331_v35, %v3485_v58  ;;  %v2333_v5 = vpop.f32.mrb[115].mxu0 }
 0x4c9   :  { %v2935_v38 = vpop.eup %2934  ;;  %2940 = vtanh.f32 %v2332_v37 }
 0x4ca   :  { %2461 = vst [vmem:[#allocation8 + $0x30] sm:$0xff] %v2935_v38 }
 0x4cb   :  { %v2937_v39 = vpop.eup %2936 }
 0x4cc   :  { %2462 = vst [vmem:[#allocation8 + $0x38] sm:$0xff] %v2937_v39  ;;  %v2336_v41 = vpop.f32.mrb[116].mxu0 }
 0x4cd   :  { %v2337_v43 = vadd.f32 %v2336_v41, %v3485_v58  ;;  %v2338_v44 = vpop.f32.mrb[117].mxu0 }
 0x4ce   :  { %v2339_v45 = vpop.f32.mrb[118].mxu0 }
 0x4cf   :  { %2942 = vtanh.f32 %v2337_v43  ;;  %v2340_v47 = vadd.f32 %v2339_v45, %v3485_v58  ;;  %v2341_v6 = vpop.f32.mrb[119].mxu0 }
 0x4d1   :  { %v2939_v7 = vpop.eup %2938  ;;  %2944 = vtanh.f32 %v2340_v47 }
 0x4d2   :  { %2463 = vst [vmem:[#allocation8 + $0x40] sm:$0xff] %v2939_v7 }
 0x4d3   :  { %v2941_v48 = vpop.eup %2940 }
 0x4d4   :  { %2464 = vst [vmem:[#allocation8 + $0x48] sm:$0xff] %v2941_v48  ;;  %v2344_v36 = vpop.f32.mrb[120].mxu0 }
 0x4d5   :  { %v2345_v40 = vadd.f32 %v2344_v36, %v3485_v58  ;;  %v2346_v8 = vpop.f32.mrb[121].mxu0 }
 0x4d6   :  { %v2347_v12 = vpop.f32.mrb[122].mxu0 }
 0x4d7   :  { %2946 = vtanh.f32 %v2345_v40  ;;  %v2348_v42 = vadd.f32 %v2347_v12, %v3485_v58  ;;  %v2349_v46 = vpop.f32.mrb[123].mxu0 }
 0x4d9   :  { %v2943_v16 = vpop.eup %2942  ;;  %2948 = vtanh.f32 %v2348_v42 }
 0x4da   :  { %2465 = vst [vmem:[#allocation8 + $0x50] sm:$0xff] %v2943_v16 }
 0x4db   :  { %v2945_v20 = vpop.eup %2944 }
 0x4dc   :  { %2466 = vst [vmem:[#allocation8 + $0x58] sm:$0xff] %v2945_v20  ;;  %v2352_v28 = vpop.f32.mrb[124].mxu0 }
 0x4dd   :  { %v2353_v32 = vadd.f32 %v2352_v28, %v3485_v58  ;;  %v2354_v49 = vpop.f32.mrb[125].mxu0 }
 0x4de   :  { %v2355_v50 = vpop.f32.mrb[126].mxu0 }
 0x4df   :  { %2950 = vtanh.f32 %v2353_v32  ;;  %v2356_v51 = vadd.f32 %v2355_v50, %v3485_v58  ;;  %v2357_v53 = vpop.f32.mrb[127].mxu0 }
 0x4e1   :  { %v2947_v54 = vpop.eup %2946  ;;  %2952 = vtanh.f32 %v2356_v51 }
 0x4e2   :  { %2467 = vst [vmem:[#allocation8 + $0x60] sm:$0xff] %v2947_v54 }
 0x4e3   :  { %v2949_v55 = vpop.eup %2948 }
 0x4e4   :  { %2468 = vst [vmem:[#allocation8 + $0x68] sm:$0xff] %v2949_v55  ;;  %v2360_v57 = vpop.f32.mrb[128].mxu0 }
 0x4e5   :  { %v2361_v59 = vadd.f32 %v2360_v57, %v3485_v58  ;;  %v2362_v60 = vpop.f32.mrb[129].mxu0 }
 0x4e6   :  { %v2363_v21 = vpop.f32.mrb[130].mxu0 }
 0x4e7   :  { %2954 = vtanh.f32 %v2361_v59  ;;  %v2364_v61 = vadd.f32 %v2363_v21, %v3485_v58  ;;  %v2365_v22 = vpop.f32.mrb[131].mxu0 }
 0x4e9   :  { %v2951_v62 = vpop.eup %2950  ;;  %2956 = vtanh.f32 %v2364_v61 }
 0x4ea   :  { %2469 = vst [vmem:[#allocation8 + $0x70] sm:$0xff] %v2951_v62 }
 0x4eb   :  { %v2953_v52 = vpop.eup %2952 }
 0x4ec   :  { %2470 = vst [vmem:[#allocation8 + $0x78] sm:$0xff] %v2953_v52  ;;  %v2368_v63 = vpop.f32.mrb[132].mxu0 }
 0x4ed   :  { %v2369_v1 = vadd.f32 %v2368_v63, %v3485_v58  ;;  %v2370_v3 = vpop.f32.mrb[133].mxu0 }
 0x4ee   :  { %v2371_v0 = vpop.f32.mrb[134].mxu0 }
 0x4ef   :  { %2958 = vtanh.f32 %v2369_v1  ;;  %v2372_v4 = vadd.f32 %v2371_v0, %v3485_v58  ;;  %v2373_v9 = vpop.f32.mrb[135].mxu0 }
 0x4f1   :  { %v2955_v10 = vpop.eup %2954  ;;  %2960 = vtanh.f32 %v2372_v4 }
 0x4f2   :  { %2471 = vst [vmem:[#allocation8 + $0x80] sm:$0xff] %v2955_v10 }
 0x4f3   :  { %v2957_v11 = vpop.eup %2956 }
 0x4f4   :  { %2472 = vst [vmem:[#allocation8 + $0x88] sm:$0xff] %v2957_v11  ;;  %v2376_v13 = vpop.f32.mrb[136].mxu0 }
 0x4f5   :  { %v2377_v14 = vadd.f32 %v2376_v13, %v3485_v58  ;;  %v2378_v15 = vpop.f32.mrb[137].mxu0 }
 0x4f6   :  { %v2379_v17 = vpop.f32.mrb[138].mxu0 }
 0x4f7   :  { %2962 = vtanh.f32 %v2377_v14  ;;  %v2380_v18 = vadd.f32 %v2379_v17, %v3485_v58  ;;  %v2381_v19 = vpop.f32.mrb[139].mxu0 }
 0x4f9   :  { %v2959_v56 = vpop.eup %2958  ;;  %2964 = vtanh.f32 %v2380_v18 }
 0x4fa   :  { %2473 = vst [vmem:[#allocation8 + $0x90] sm:$0xff] %v2959_v56 }
 0x4fb   :  { %v2961_v23 = vpop.eup %2960 }
 0x4fc   :  { %2474 = vst [vmem:[#allocation8 + $0x98] sm:$0xff] %v2961_v23  ;;  %v2384_v24 = vpop.f32.mrb[140].mxu0 }
 0x4fd   :  { %v2385_v2 = vadd.f32 %v2384_v24, %v3485_v58  ;;  %v2386_v25 = vpop.f32.mrb[141].mxu0 }
 0x4fe   :  { %v2387_v26 = vpop.f32.mrb[142].mxu0 }
 0x4ff   :  { %2966 = vtanh.f32 %v2385_v2  ;;  %v2388_v27 = vadd.f32 %v2387_v26, %v3485_v58  ;;  %v2389_v29 = vpop.f32.mrb[143].mxu0 }
 0x501   :  { %v2963_v30 = vpop.eup %2962  ;;  %2968 = vtanh.f32 %v2388_v27 }
 0x502   :  { %2475 = vst [vmem:[#allocation8 + $0xa0] sm:$0xff] %v2963_v30 }
 0x503   :  { %v2965_v31 = vpop.eup %2964 }
 0x504   :  { %2476 = vst [vmem:[#allocation8 + $0xa8] sm:$0xff] %v2965_v31  ;;  %v2392_v33 = vpop.f32.mrb[144].mxu0 }
 0x505   :  { %v2393_v34 = vadd.f32 %v2392_v33, %v3485_v58  ;;  %v2394_v35 = vpop.f32.mrb[145].mxu0 }
 0x506   :  { %v2395_v37 = vpop.f32.mrb[146].mxu0 }
 0x507   :  { %2970 = vtanh.f32 %v2393_v34  ;;  %v2396_v5 = vadd.f32 %v2395_v37, %v3485_v58  ;;  %v2397_v38 = vpop.f32.mrb[147].mxu0 }
 0x509   :  { %v2967_v39 = vpop.eup %2966  ;;  %2972 = vtanh.f32 %v2396_v5 }
 0x50a   :  { %2477 = vst [vmem:[#allocation8 + $0xb0] sm:$0xff] %v2967_v39 }
 0x50b   :  { %v2969_v41 = vpop.eup %2968 }
 0x50c   :  { %2478 = vst [vmem:[#allocation8 + $0xb8] sm:$0xff] %v2969_v41  ;;  %v2400_v43 = vpop.f32.mrb[148].mxu0 }
 0x50d   :  { %v2401_v44 = vadd.f32 %v2400_v43, %v3485_v58  ;;  %v2402_v45 = vpop.f32.mrb[149].mxu0 }
 0x50e   :  { %v2403_v47 = vpop.f32.mrb[150].mxu0 }
 0x50f   :  { %2974 = vtanh.f32 %v2401_v44  ;;  %v2404_v6 = vadd.f32 %v2403_v47, %v3485_v58  ;;  %v2405_v7 = vpop.f32.mrb[151].mxu0 }
 0x511   :  { %v2971_v48 = vpop.eup %2970  ;;  %2976 = vtanh.f32 %v2404_v6 }
 0x512   :  { %2479 = vst [vmem:[#allocation8 + $0xc0] sm:$0xff] %v2971_v48 }
 0x513   :  { %v2973_v36 = vpop.eup %2972 }
 0x514   :  { %2480 = vst [vmem:[#allocation8 + $0xc8] sm:$0xff] %v2973_v36  ;;  %v2408_v40 = vpop.f32.mrb[152].mxu0 }
 0x515   :  { %v2409_v8 = vadd.f32 %v2408_v40, %v3485_v58  ;;  %v2410_v12 = vpop.f32.mrb[153].mxu0 }
 0x516   :  { %v2411_v42 = vpop.f32.mrb[154].mxu0 }
 0x517   :  { %2978 = vtanh.f32 %v2409_v8  ;;  %v2412_v46 = vadd.f32 %v2411_v42, %v3485_v58  ;;  %v2413_v16 = vpop.f32.mrb[155].mxu0 }
 0x519   :  { %v2975_v20 = vpop.eup %2974  ;;  %2980 = vtanh.f32 %v2412_v46 }
 0x51a   :  { %2481 = vst [vmem:[#allocation8 + $0xd0] sm:$0xff] %v2975_v20 }
 0x51b   :  { %v2977_v28 = vpop.eup %2976 }
 0x51c   :  { %2482 = vst [vmem:[#allocation8 + $0xd8] sm:$0xff] %v2977_v28  ;;  %v2416_v32 = vpop.f32.mrb[156].mxu0 }
 0x51d   :  { %v2417_v49 = vadd.f32 %v2416_v32, %v3485_v58  ;;  %v2418_v50 = vpop.f32.mrb[157].mxu0 }
 0x51e   :  { %v2419_v51 = vpop.f32.mrb[158].mxu0 }
 0x51f   :  { %2982 = vtanh.f32 %v2417_v49  ;;  %v2420_v53 = vadd.f32 %v2419_v51, %v3485_v58  ;;  %v2421_v54 = vpop.f32.mrb[159].mxu0 }
 0x521   :  { %v2979_v55 = vpop.eup %2978  ;;  %2984 = vtanh.f32 %v2420_v53 }
 0x522   :  { %2483 = vst [vmem:[#allocation8 + $0xe0] sm:$0xff] %v2979_v55 }
 0x523   :  { %v2981_v57 = vpop.eup %2980 }
 0x524   :  { %2484 = vst [vmem:[#allocation8 + $0xe8] sm:$0xff] %v2981_v57 }
 0x529   :  { %v2983_v59 = vpop.eup %2982 }
 0x52a   :  { %2485 = vst [vmem:[#allocation8 + $0xf0] sm:$0xff] %v2983_v59 }
 0x52b   :  { %v2985_v60 = vpop.eup %2984 }
 0x52c   :  { %2486 = vst [vmem:[#allocation8 + $0xf8] sm:$0xff] %v2985_v60 }
 0x52d   :  { %3063 = shalt.err (!%p3060_p0)
}
 0x52e   :  { %s3064_s29 = scalar_lea.hbm %s3537_s3, 4096 }
 0x52f   :  { %p3065_p1 = scmp.ne.s32.totalorder %s3537_s3, %s3064_s29  ;;  %p3068_p2 = scmp.lt.u32.totalorder %s3064_s29, %s3537_s3 }
 0x531   :  { %p3070_p3 = pnand %p3068_p2, %p3065_p1 }
 0x533   :  { %3073 = shalt.err (!%p3070_p3)
}
 0x534   :  { %2498 = dma.vmem_to_hbm [thread:$0]  %s2493_s25, 4096, %s3537_s3, [#allocation4], %s3081_s22, %s3081_s22, %s3082_s23  }
 0x535   :  { %3078 = dma.done.wait [#allocation4], 4096  }
 0x536   :  { %3079 = vsyncadd [#allocation4], 4294963200 }
 0x537   :  { %2502 = vsyncpa [#allocation3], 1 }
 0x538   :  { %2503 = vsyncpa [#allocation6], 1 }
 0x539   :  { %2504 = vsyncpa [#allocation4], 1 }

</bundles_post_ra>
